<compile_context>
chip_gen: v7x
topology: tpu7x:2x2x1
jax: 0.10.0
libtpu: 0.0.40
codegen_flags: <defaults>
</compile_context>

<pallas_src>
import functools
import math

import jax
import jax.numpy as jnp
from jax.experimental import pallas as pl
from jax.experimental.pallas import tpu as pltpu

LANE = 128
DROP_P = 0.5


def _round_up(v, m):
    return ((v + m - 1) // m) * m


def _pick_tile(dim):
    """Largest of {512, 256, 128} that divides `dim` (dim is a multiple of 128)."""
    for t in (512, 256, 128):
        if dim % t == 0:
            return t
    return dim


def _pad2(a, rows, cols):
    pr, pc = rows - a.shape[0], cols - a.shape[1]
    if pr or pc:
        a = jnp.pad(a, ((0, pr), (0, pc)))
    return a


def _fused_matmul_kernel(*refs, has_bias, has_mask, relu):
    """acc += A_tile @ B_tile; at k==last: out = [relu](acc [+ bias]) [* mask]."""
    idx = 0
    a_ref = refs[idx]; idx += 1
    b_ref = refs[idx]; idx += 1
    bias_ref = None
    mask_ref = None
    if has_bias:
        bias_ref = refs[idx]; idx += 1
    if has_mask:
        mask_ref = refs[idx]; idx += 1
    o_ref, acc_ref = refs[idx], refs[idx + 1]

    k = pl.program_id(2)

    @pl.when(k == 0)
    def _init():
        acc_ref[...] = jnp.zeros(acc_ref.shape, jnp.float32)

    acc_ref[...] += jnp.dot(a_ref[...], b_ref[...],
                            preferred_element_type=jnp.float32)

    @pl.when(k == pl.num_programs(2) - 1)
    def _epilogue():
        res = acc_ref[...]
        if has_bias:
            res = res + bias_ref[...].astype(jnp.float32)
        if relu:
            res = jnp.maximum(res, 0.0)
        if has_mask:
            res = res * mask_ref[...]
        o_ref[...] = res.astype(o_ref.dtype)


def _fused_matmul(a, b, bias=None, mask=None, relu=False, out_dtype=jnp.float32):
    """Tiled (i, j, k) matmul with fused bias/relu/mask epilogue. Shapes must be
    multiples of 128 (the caller pads)."""
    M, K = a.shape
    Kb, N = b.shape
    assert K == Kb
    tm, tn, tk = _pick_tile(M), _pick_tile(N), _pick_tile(K)
    grid = (M // tm, N // tn, K // tk)

    in_specs = [
        pl.BlockSpec((tm, tk), lambda i, j, k: (i, k)),   # A
        pl.BlockSpec((tk, tn), lambda i, j, k: (k, j)),   # B
    ]
    operands = [a, b]
    if bias is not None:
        in_specs.append(pl.BlockSpec((1, tn), lambda i, j, k: (0, j)))
        operands.append(bias)
    if mask is not None:
        in_specs.append(pl.BlockSpec((tm, tn), lambda i, j, k: (i, j)))
        operands.append(mask)

    kernel = functools.partial(
        _fused_matmul_kernel,
        has_bias=bias is not None, has_mask=mask is not None, relu=relu)

    return pl.pallas_call(
        kernel,
        out_shape=jax.ShapeDtypeStruct((M, N), out_dtype),
        grid=grid,
        in_specs=in_specs,
        out_specs=pl.BlockSpec((tm, tn), lambda i, j, k: (i, j)),
        scratch_shapes=[pltpu.VMEM((tm, tn), jnp.float32)],
        compiler_params=pltpu.CompilerParams(
            dimension_semantics=("parallel", "parallel", "arbitrary"),
            vmem_limit_bytes=32 * 1024 * 1024),
    )(*operands)


def hgnn_embedding(x, G, w1, b1, w2, b2, dropout_mask=None):
    """Forward pass of HGNN_embedding.

    dropout_mask: pre-scaled keep mask of shape [N, n_hid] with values in
    {0, 1/(1-p)} (training mode), or None to skip dropout (eval mode).
    """
    N, in_ch = x.shape
    n_hid = w1.shape[1]

    Np = _round_up(N, LANE)
    Cp = _round_up(in_ch, LANE)
    Hp = _round_up(n_hid, LANE)

    # bf16 MXU operands (f32 accumulation happens inside the kernel).
    xp = _pad2(x, Np, Cp).astype(jnp.bfloat16)
    Gp = _pad2(G, Np, Np).astype(jnp.bfloat16)
    w1p = _pad2(w1, Cp, Hp).astype(jnp.bfloat16)
    w2p = _pad2(w2, Hp, Hp).astype(jnp.bfloat16)
    b1p = _pad2(b1.reshape(1, -1).astype(jnp.float32), 1, Hp)
    b2p = _pad2(b2.reshape(1, -1).astype(jnp.float32), 1, Hp)

    maskp = None
    if dropout_mask is not None:
        maskp = _pad2(dropout_mask.astype(jnp.float32), Np, Hp)

    # ---- layer 1: h = dropout(relu(G @ (x @ W1 + b1))) ----
    xw1 = _fused_matmul(xp, w1p, bias=b1p, out_dtype=jnp.bfloat16)
    h = _fused_matmul(Gp, xw1, mask=maskp, relu=True, out_dtype=jnp.bfloat16)

    # ---- layer 2: out = relu(G @ (h @ W2 + b2)) ----
    xw2 = _fused_matmul(h, w2p, bias=b2p, out_dtype=jnp.bfloat16)
    out = _fused_matmul(Gp, xw2, relu=True, out_dtype=jnp.float32)

    return out[:N, :n_hid]


def init_params(key, in_ch, n_hid):
    """Mimics HGNN_conv.reset_parameters: uniform(-stdv, stdv), stdv = 1/sqrt(out_ft)."""
    k1, k2, k3, k4 = jax.random.split(key, 4)
    stdv = 1.0 / math.sqrt(n_hid)
    w1 = jax.random.uniform(k1, (in_ch, n_hid), jnp.float32, -stdv, stdv)
    b1 = jax.random.uniform(k2, (n_hid,), jnp.float32, -stdv, stdv)
    w2 = jax.random.uniform(k3, (n_hid, n_hid), jnp.float32, -stdv, stdv)
    b2 = jax.random.uniform(k4, (n_hid,), jnp.float32, -stdv, stdv)
    return w1, b1, w2, b2


if __name__ == "__main__":
    key = jax.random.PRNGKey(0)
    kx, kg, kp, kd = jax.random.split(key, 4)

    # Small, deliberately non-128-aligned shapes to exercise the padding path.
    N, in_ch, n_hid = 200, 96, 64

    x = jax.random.normal(kx, (N, in_ch), jnp.float32)
    G = jax.random.uniform(kg, (N, N), jnp.float32) / N    # dense hypergraph propagation matrix
    w1, b1, w2, b2 = init_params(kp, in_ch, n_hid)

    # Dropout keep-mask, pre-scaled by 1/(1-p) (F.dropout training=True semantics).
    keep = jax.random.bernoulli(kd, 1.0 - DROP_P, (N, n_hid))
    mask = keep.astype(jnp.float32) / (1.0 - DROP_P)

    fwd = jax.jit(hgnn_embedding)
    out = fwd(x, G, w1, b1, w2, b2, mask)
    jax.block_until_ready(out)
    assert out.shape == (N, n_hid)

    # Pure-JAX f32 reference with the same dropout mask (loose tol: bf16 operands).
    h_ref = jnp.maximum(G @ (x @ w1 + b1[None, :]), 0.0) * mask
    ref = jnp.maximum(G @ (h_ref @ w2 + b2[None, :]), 0.0)
    err = float(jnp.max(jnp.abs(out - ref)))
    assert err < 5e-2, f"max abs err {err}"

    print("KERNEL_OK")
</pallas_src>

<mosaic_0001>
module attributes {stable_mosaic.version = 11 : i64} {
  func.func @_fused_matmul_kernel(%arg0: i32, %arg1: i32, %arg2: i32, %arg3: memref<256x128xbf16, #tpu.memory_space<vmem>>, %arg4: memref<128x128xbf16, #tpu.memory_space<vmem>>, %arg5: memref<1x128xf32, #tpu.memory_space<vmem>>, %arg6: memref<256x128xbf16, #tpu.memory_space<vmem>>, %arg7: memref<256x128xf32, #tpu.memory_space<vmem>>) attributes {dimension_semantics = [#tpu.dimension_semantics<parallel>, #tpu.dimension_semantics<parallel>, #tpu.dimension_semantics<arbitrary>], iteration_bounds = array<i64: 1, 1, 1>, scalar_prefetch = 0 : i64, scratch_operands = 1 : i64, tpu.core_type = #tpu.core_type<tc>, window_params = [{transform_indices = @transform_0, window_bounds = array<i64: 256, 128>}, {transform_indices = @transform_1, window_bounds = array<i64: 128, 128>}, {transform_indices = @transform_2, window_bounds = array<i64: 1, 128>}, {transform_indices = @transform_3, window_bounds = array<i64: 256, 128>}]} {
    %c0_i32 = arith.constant 0 : i32
    %0 = arith.cmpi eq, %arg2, %c0_i32 : i32
    %1 = arith.extui %0 : i1 to i32
    %c0_i32_0 = arith.constant 0 : i32
    %2 = arith.cmpi ne, %1, %c0_i32_0 : i32
    scf.if %2 {
      %cst_10 = arith.constant 0.000000e+00 : f32
      %12 = vector.broadcast %cst_10 : f32 to vector<256x128xf32>
      %c0_11 = arith.constant 0 : index
      %c0_12 = arith.constant 0 : index
      %13 = vector.load %arg7[%c0_11, %c0_12] : memref<256x128xf32, #tpu.memory_space<vmem>>, vector<256x128xf32>
      tpu.vector_store %arg7[%c0_11, %c0_12], %12 {strides = array<i32>} : memref<256x128xf32, #tpu.memory_space<vmem>>, vector<256x128xf32>,
    } else {
    }
    %c0 = arith.constant 0 : index
    %c0_1 = arith.constant 0 : index
    %3 = vector.load %arg7[%c0, %c0_1] : memref<256x128xf32, #tpu.memory_space<vmem>>, vector<256x128xf32>
    %c0_2 = arith.constant 0 : index
    %c0_3 = arith.constant 0 : index
    %4 = vector.load %arg3[%c0_2, %c0_3] : memref<256x128xbf16, #tpu.memory_space<vmem>>, vector<256x128xbf16>
    %c0_4 = arith.constant 0 : index
    %c0_5 = arith.constant 0 : index
    %5 = vector.load %arg4[%c0_4, %c0_5] : memref<128x128xbf16, #tpu.memory_space<vmem>>, vector<128x128xbf16>
    %cst = arith.constant dense<0.000000e+00> : vector<256x128xf32>
    %6 = tpu.matmul %4, %5, %cst {dimension_numbers = #tpu.dot_dimension_numbers<[1], [0], [0], [1], [0, 0, 1, 1], [], []>} : vector<256x128xbf16>, vector<128x128xbf16>, vector<256x128xf32> -> vector<256x128xf32>
    %7 = arith.addf %3, %6 : vector<256x128xf32>
    %c0_6 = arith.constant 0 : index
    %c0_7 = arith.constant 0 : index
    %8 = vector.load %arg7[%c0_6, %c0_7] : memref<256x128xf32, #tpu.memory_space<vmem>>, vector<256x128xf32>
    tpu.vector_store %arg7[%c0_6, %c0_7], %7 {strides = array<i32>} : memref<256x128xf32, #tpu.memory_space<vmem>>, vector<256x128xf32>,
    %c0_i32_8 = arith.constant 0 : i32
    %9 = arith.cmpi eq, %arg2, %c0_i32_8 : i32
    %10 = arith.extui %9 : i1 to i32
    %c0_i32_9 = arith.constant 0 : i32
    %11 = arith.cmpi ne, %10, %c0_i32_9 : i32
    scf.if %11 {
      %c0_10 = arith.constant 0 : index
      %c0_11 = arith.constant 0 : index
      %12 = vector.load %arg7[%c0_10, %c0_11] : memref<256x128xf32, #tpu.memory_space<vmem>>, vector<256x128xf32>
      %c0_12 = arith.constant 0 : index
      %c0_13 = arith.constant 0 : index
      %13 = vector.load %arg5[%c0_12, %c0_13] : memref<1x128xf32, #tpu.memory_space<vmem>>, vector<1x128xf32>
      %14 = vector.broadcast %13 : vector<1x128xf32> to vector<256x128xf32>
      %15 = arith.addf %12, %14 : vector<256x128xf32>
      %16 = arith.truncf %15 : vector<256x128xf32> to vector<256x128xbf16>
      %c0_14 = arith.constant 0 : index
      %c0_15 = arith.constant 0 : index
      %17 = vector.load %arg6[%c0_14, %c0_15] : memref<256x128xbf16, #tpu.memory_space<vmem>>, vector<256x128xbf16>
      tpu.vector_store %arg6[%c0_14, %c0_15], %16 {strides = array<i32>} : memref<256x128xbf16, #tpu.memory_space<vmem>>, vector<256x128xbf16>,
    } else {
    }
    return
  }
  func.func @transform_0(%arg0: i32, %arg1: i32, %arg2: i32) -> (i32, i32) {
    %c0_i32 = arith.constant 0 : i32
    return %arg0, %arg2 : i32, i32
  }
  func.func @transform_1(%arg0: i32, %arg1: i32, %arg2: i32) -> (i32, i32) {
    %c0_i32 = arith.constant 0 : i32
    return %arg2, %arg1 : i32, i32
  }
  func.func @transform_2(%arg0: i32, %arg1: i32, %arg2: i32) -> (i32, i32) {
    %c0_i32 = arith.constant 0 : i32
    %c0_i32_0 = arith.constant 0 : i32
    return %c0_i32, %arg1 : i32, i32
  }
  func.func @transform_3(%arg0: i32, %arg1: i32, %arg2: i32) -> (i32, i32) {
    %c0_i32 = arith.constant 0 : i32
    return %arg0, %arg1 : i32, i32
  }
}

module attributes {stable_mosaic.version = 11 : i64} {
  func.func @_fused_matmul_kernel(%arg0: i32, %arg1: i32, %arg2: i32, %arg3: memref<256x256xbf16, #tpu.memory_space<vmem>>, %arg4: memref<256x128xbf16, #tpu.memory_space<vmem>>, %arg5: memref<256x128xf32, #tpu.memory_space<vmem>>, %arg6: memref<256x128xbf16, #tpu.memory_space<vmem>>, %arg7: memref<256x128xf32, #tpu.memory_space<vmem>>) attributes {dimension_semantics = [#tpu.dimension_semantics<parallel>, #tpu.dimension_semantics<parallel>, #tpu.dimension_semantics<arbitrary>], iteration_bounds = array<i64: 1, 1, 1>, scalar_prefetch = 0 : i64, scratch_operands = 1 : i64, tpu.core_type = #tpu.core_type<tc>, window_params = [{transform_indices = @transform_0, window_bounds = array<i64: 256, 256>}, {transform_indices = @transform_1, window_bounds = array<i64: 256, 128>}, {transform_indices = @transform_2, window_bounds = array<i64: 256, 128>}, {transform_indices = @transform_3, window_bounds = array<i64: 256, 128>}]} {
    %c0_i32 = arith.constant 0 : i32
    %0 = arith.cmpi eq, %arg2, %c0_i32 : i32
    %1 = arith.extui %0 : i1 to i32
    %c0_i32_0 = arith.constant 0 : i32
    %2 = arith.cmpi ne, %1, %c0_i32_0 : i32
    scf.if %2 {
      %cst_10 = arith.constant 0.000000e+00 : f32
      %12 = vector.broadcast %cst_10 : f32 to vector<256x128xf32>
      %c0_11 = arith.constant 0 : index
      %c0_12 = arith.constant 0 : index
      %13 = vector.load %arg7[%c0_11, %c0_12] : memref<256x128xf32, #tpu.memory_space<vmem>>, vector<256x128xf32>
      tpu.vector_store %arg7[%c0_11, %c0_12], %12 {strides = array<i32>} : memref<256x128xf32, #tpu.memory_space<vmem>>, vector<256x128xf32>,
    } else {
    }
    %c0 = arith.constant 0 : index
    %c0_1 = arith.constant 0 : index
    %3 = vector.load %arg7[%c0, %c0_1] : memref<256x128xf32, #tpu.memory_space<vmem>>, vector<256x128xf32>
    %c0_2 = arith.constant 0 : index
    %c0_3 = arith.constant 0 : index
    %4 = vector.load %arg3[%c0_2, %c0_3] : memref<256x256xbf16, #tpu.memory_space<vmem>>, vector<256x256xbf16>
    %c0_4 = arith.constant 0 : index
    %c0_5 = arith.constant 0 : index
    %5 = vector.load %arg4[%c0_4, %c0_5] : memref<256x128xbf16, #tpu.memory_space<vmem>>, vector<256x128xbf16>
    %cst = arith.constant dense<0.000000e+00> : vector<256x128xf32>
    %6 = tpu.matmul %4, %5, %cst {dimension_numbers = #tpu.dot_dimension_numbers<[1], [0], [0], [1], [0, 0, 1, 1], [], []>} : vector<256x256xbf16>, vector<256x128xbf16>, vector<256x128xf32> -> vector<256x128xf32>
    %7 = arith.addf %3, %6 : vector<256x128xf32>
    %c0_6 = arith.constant 0 : index
    %c0_7 = arith.constant 0 : index
    %8 = vector.load %arg7[%c0_6, %c0_7] : memref<256x128xf32, #tpu.memory_space<vmem>>, vector<256x128xf32>
    tpu.vector_store %arg7[%c0_6, %c0_7], %7 {strides = array<i32>} : memref<256x128xf32, #tpu.memory_space<vmem>>, vector<256x128xf32>,
    %c0_i32_8 = arith.constant 0 : i32
    %9 = arith.cmpi eq, %arg2, %c0_i32_8 : i32
    %10 = arith.extui %9 : i1 to i32
    %c0_i32_9 = arith.constant 0 : i32
    %11 = arith.cmpi ne, %10, %c0_i32_9 : i32
    scf.if %11 {
      %c0_10 = arith.constant 0 : index
      %c0_11 = arith.constant 0 : index
      %12 = vector.load %arg7[%c0_10, %c0_11] : memref<256x128xf32, #tpu.memory_space<vmem>>, vector<256x128xf32>
      %cst_12 = arith.constant 0.000000e+00 : f32
      %13 = vector.broadcast %cst_12 : f32 to vector<256x128xf32>
      %14 = arith.maximumf %12, %13 : vector<256x128xf32>
      %c0_13 = arith.constant 0 : index
      %c0_14 = arith.constant 0 : index
      %15 = vector.load %arg5[%c0_13, %c0_14] : memref<256x128xf32, #tpu.memory_space<vmem>>, vector<256x128xf32>
      %16 = arith.mulf %14, %15 : vector<256x128xf32>
      %17 = arith.truncf %16 : vector<256x128xf32> to vector<256x128xbf16>
      %c0_15 = arith.constant 0 : index
      %c0_16 = arith.constant 0 : index
      %18 = vector.load %arg6[%c0_15, %c0_16] : memref<256x128xbf16, #tpu.memory_space<vmem>>, vector<256x128xbf16>
      tpu.vector_store %arg6[%c0_15, %c0_16], %17 {strides = array<i32>} : memref<256x128xbf16, #tpu.memory_space<vmem>>, vector<256x128xbf16>,
    } else {
    }
    return
  }
  func.func @transform_0(%arg0: i32, %arg1: i32, %arg2: i32) -> (i32, i32) {
    %c0_i32 = arith.constant 0 : i32
    return %arg0, %arg2 : i32, i32
  }
  func.func @transform_1(%arg0: i32, %arg1: i32, %arg2: i32) -> (i32, i32) {
    %c0_i32 = arith.constant 0 : i32
    return %arg2, %arg1 : i32, i32
  }
  func.func @transform_2(%arg0: i32, %arg1: i32, %arg2: i32) -> (i32, i32) {
    %c0_i32 = arith.constant 0 : i32
    return %arg0, %arg1 : i32, i32
  }
  func.func @transform_3(%arg0: i32, %arg1: i32, %arg2: i32) -> (i32, i32) {
    %c0_i32 = arith.constant 0 : i32
    return %arg0, %arg1 : i32, i32
  }
}

module attributes {stable_mosaic.version = 11 : i64} {
  func.func @_fused_matmul_kernel(%arg0: i32, %arg1: i32, %arg2: i32, %arg3: memref<256x256xbf16, #tpu.memory_space<vmem>>, %arg4: memref<256x128xbf16, #tpu.memory_space<vmem>>, %arg5: memref<256x128xf32, #tpu.memory_space<vmem>>, %arg6: memref<256x128xf32, #tpu.memory_space<vmem>>) attributes {dimension_semantics = [#tpu.dimension_semantics<parallel>, #tpu.dimension_semantics<parallel>, #tpu.dimension_semantics<arbitrary>], iteration_bounds = array<i64: 1, 1, 1>, scalar_prefetch = 0 : i64, scratch_operands = 1 : i64, tpu.core_type = #tpu.core_type<tc>, window_params = [{transform_indices = @transform_0, window_bounds = array<i64: 256, 256>}, {transform_indices = @transform_1, window_bounds = array<i64: 256, 128>}, {transform_indices = @transform_2, window_bounds = array<i64: 256, 128>}]} {
    %c0_i32 = arith.constant 0 : i32
    %0 = arith.cmpi eq, %arg2, %c0_i32 : i32
    %1 = arith.extui %0 : i1 to i32
    %c0_i32_0 = arith.constant 0 : i32
    %2 = arith.cmpi ne, %1, %c0_i32_0 : i32
    scf.if %2 {
      %cst_10 = arith.constant 0.000000e+00 : f32
      %12 = vector.broadcast %cst_10 : f32 to vector<256x128xf32>
      %c0_11 = arith.constant 0 : index
      %c0_12 = arith.constant 0 : index
      %13 = vector.load %arg6[%c0_11, %c0_12] : memref<256x128xf32, #tpu.memory_space<vmem>>, vector<256x128xf32>
      tpu.vector_store %arg6[%c0_11, %c0_12], %12 {strides = array<i32>} : memref<256x128xf32, #tpu.memory_space<vmem>>, vector<256x128xf32>,
    } else {
    }
    %c0 = arith.constant 0 : index
    %c0_1 = arith.constant 0 : index
    %3 = vector.load %arg6[%c0, %c0_1] : memref<256x128xf32, #tpu.memory_space<vmem>>, vector<256x128xf32>
    %c0_2 = arith.constant 0 : index
    %c0_3 = arith.constant 0 : index
    %4 = vector.load %arg3[%c0_2, %c0_3] : memref<256x256xbf16, #tpu.memory_space<vmem>>, vector<256x256xbf16>
    %c0_4 = arith.constant 0 : index
    %c0_5 = arith.constant 0 : index
    %5 = vector.load %arg4[%c0_4, %c0_5] : memref<256x128xbf16, #tpu.memory_space<vmem>>, vector<256x128xbf16>
    %cst = arith.constant dense<0.000000e+00> : vector<256x128xf32>
    %6 = tpu.matmul %4, %5, %cst {dimension_numbers = #tpu.dot_dimension_numbers<[1], [0], [0], [1], [0, 0, 1, 1], [], []>} : vector<256x256xbf16>, vector<256x128xbf16>, vector<256x128xf32> -> vector<256x128xf32>
    %7 = arith.addf %3, %6 : vector<256x128xf32>
    %c0_6 = arith.constant 0 : index
    %c0_7 = arith.constant 0 : index
    %8 = vector.load %arg6[%c0_6, %c0_7] : memref<256x128xf32, #tpu.memory_space<vmem>>, vector<256x128xf32>
    tpu.vector_store %arg6[%c0_6, %c0_7], %7 {strides = array<i32>} : memref<256x128xf32, #tpu.memory_space<vmem>>, vector<256x128xf32>,
    %c0_i32_8 = arith.constant 0 : i32
    %9 = arith.cmpi eq, %arg2, %c0_i32_8 : i32
    %10 = arith.extui %9 : i1 to i32
    %c0_i32_9 = arith.constant 0 : i32
    %11 = arith.cmpi ne, %10, %c0_i32_9 : i32
    scf.if %11 {
      %c0_10 = arith.constant 0 : index
      %c0_11 = arith.constant 0 : index
      %12 = vector.load %arg6[%c0_10, %c0_11] : memref<256x128xf32, #tpu.memory_space<vmem>>, vector<256x128xf32>
      %cst_12 = arith.constant 0.000000e+00 : f32
      %13 = vector.broadcast %cst_12 : f32 to vector<256x128xf32>
      %14 = arith.maximumf %12, %13 : vector<256x128xf32>
      %c0_13 = arith.constant 0 : index
      %c0_14 = arith.constant 0 : index
      %15 = vector.load %arg5[%c0_13, %c0_14] : memref<256x128xf32, #tpu.memory_space<vmem>>, vector<256x128xf32>
      tpu.vector_store %arg5[%c0_13, %c0_14], %14 {strides = array<i32>} : memref<256x128xf32, #tpu.memory_space<vmem>>, vector<256x128xf32>,
    } else {
    }
    return
  }
  func.func @transform_0(%arg0: i32, %arg1: i32, %arg2: i32) -> (i32, i32) {
    %c0_i32 = arith.constant 0 : i32
    return %arg0, %arg2 : i32, i32
  }
  func.func @transform_1(%arg0: i32, %arg1: i32, %arg2: i32) -> (i32, i32) {
    %c0_i32 = arith.constant 0 : i32
    return %arg2, %arg1 : i32, i32
  }
  func.func @transform_2(%arg0: i32, %arg1: i32, %arg2: i32) -> (i32, i32) {
    %c0_i32 = arith.constant 0 : i32
    return %arg0, %arg1 : i32, i32
  }
}

</mosaic_0001>

<bundles_post_ra>
// kernel: hgnn_embedding.4
= control target key start
LH: loop header
LB: loop body
LE: loop exit
PB: predicated region body
PF: predicated region fallthrough
CT: control target
= control target key end

     0   :  { %s1211_s1 = inlined_call_operand.vmem [shape: bf16[128,128], index: 1, kind: input, shape index: {}]   ;;  %s1212_s0 = inlined_call_operand.vmem [shape: bf16[256,128], index: 0, kind: input, shape index: {}]   ;;  %s1213_s2 = inlined_call_operand.vmem [shape: f32[1,128], index: 2, kind: input, shape index: {}]   ;;  %s1214_s3 = inlined_call_operand.vmem [shape: bf16[256,128], index: 3, kind: output, shape index: {}]  }
   0x1   :  { %v1010_v0 = vld [vmem:[%s1211_s1] sm:$0xff]   ;;  %v1011_v1 = vld [vmem:[%s1211_s1 + $0x8] sm:$0xff]   ;;  %v1012_v2 = vld [vmem:[%s1211_s1 + $0x10] sm:$0xff]  }
   0x2   :  { %946 = vmatprep.subr.bf16.mxu0 %v1010_v0  ;;  %994 = vmatprep.subr.bf16.mxu1 %v1010_v0  ;;  %v1013_v3 = vld [vmem:[%s1211_s1 + $0x18] sm:$0xff]   ;;  %v1018_v4 = vld [vmem:[%s1212_s0] sm:$0xff]   ;;  %v1015_v7 = vld [vmem:[%s1211_s1 + $0x28] sm:$0xff]  }
   0x3   :  { %947 = vmatpush3.bf16.msra.mxu0 %v1010_v0  ;;  %1002 = vmatpush3.bf16.msra.mxu1 %v1010_v0  ;;  %v1019_v5 = vld [vmem:[%s1212_s0 + $0x40] sm:$0xff]   ;;  %v1016_v8 = vld [vmem:[%s1211_s1 + $0x30] sm:$0xff]   ;;  %v1017_v9 = vld [vmem:[%s1211_s1 + $0x38] sm:$0xff]  }
   0x4   :  { %948 = vmatprep.subr.bf16.mxu0 %v1011_v1  ;;  %995 = vmatprep.subr.bf16.mxu1 %v1011_v1  ;;  %v1014_v6 = vld [vmem:[%s1211_s1 + $0x20] sm:$0xff]   ;;  %v1020_v10 = vld [vmem:[%s1212_s0 + $0x8] sm:$0xff]   ;;  %v1022_v12 = vld [vmem:[%s1212_s0 + $0x10] sm:$0xff]  }
   0x5   :  { %962 = vmatprep.mubr.bf16.mxu0 %v1018_v4  ;;  %978 = vmatprep.mubr.bf16.mxu1 %v1019_v5  ;;  %v1021_v11 = vld [vmem:[%s1212_s0 + $0x48] sm:$0xff]   ;;  %v1023_v13 = vld [vmem:[%s1212_s0 + $0x50] sm:$0xff]   ;;  %v1024_v14 = vld [vmem:[%s1212_s0 + $0x18] sm:$0xff]  }
   0x6   :  { %v1025_v15 = vld [vmem:[%s1212_s0 + $0x58] sm:$0xff]   ;;  %v1026_v16 = vld [vmem:[%s1212_s0 + $0x20] sm:$0xff]   ;;  %v1028_v18 = vld [vmem:[%s1212_s0 + $0x28] sm:$0xff]  }
   0x7   :  { %949 = vmatpush3.bf16.msra.mxu0 %v1011_v1  ;;  %1003 = vmatpush3.bf16.msra.mxu1 %v1011_v1  ;;  %v1027_v17 = vld [vmem:[%s1212_s0 + $0x60] sm:$0xff]   ;;  %v1029_v19 = vld [vmem:[%s1212_s0 + $0x68] sm:$0xff]   ;;  %v1030_v20 = vld [vmem:[%s1212_s0 + $0x30] sm:$0xff]  }
   0x8   :  { %950 = vmatprep.subr.bf16.mxu0 %v1012_v2  ;;  %996 = vmatprep.subr.bf16.mxu1 %v1012_v2  ;;  %v1031_v21 = vld [vmem:[%s1212_s0 + $0x70] sm:$0xff]   ;;  %v1032_v22 = vld [vmem:[%s1212_s0 + $0x38] sm:$0xff]   ;;  %v1129_v25 = vld [vmem:[%s1213_s2] ss:$0 sm:$0xff] }
   0x9   :  { %v1033_v23 = vld [vmem:[%s1212_s0 + $0x78] sm:$0xff]  }
   0xb   :  { %951 = vmatpush3.bf16.msra.mxu0 %v1012_v2  ;;  %1004 = vmatpush3.bf16.msra.mxu1 %v1012_v2 }
   0xc   :  { %952 = vmatprep.subr.bf16.mxu0 %v1013_v3  ;;  %997 = vmatprep.subr.bf16.mxu1 %v1013_v3 }
   0xf   :  { %953 = vmatpush3.bf16.msra.mxu0 %v1013_v3  ;;  %1005 = vmatpush3.bf16.msra.mxu1 %v1013_v3 }
  0x10   :  { %954 = vmatprep.subr.bf16.mxu0 %v1014_v6  ;;  %998 = vmatprep.subr.bf16.mxu1 %v1014_v6 }
  0x13   :  { %955 = vmatpush3.bf16.msra.mxu0 %v1014_v6  ;;  %1006 = vmatpush3.bf16.msra.mxu1 %v1014_v6 }
  0x14   :  { %956 = vmatprep.subr.bf16.mxu0 %v1015_v7  ;;  %999 = vmatprep.subr.bf16.mxu1 %v1015_v7 }
  0x17   :  { %957 = vmatpush3.bf16.msra.mxu0 %v1015_v7  ;;  %1007 = vmatpush3.bf16.msra.mxu1 %v1015_v7 }
  0x18   :  { %958 = vmatprep.subr.bf16.mxu0 %v1016_v8  ;;  %1000 = vmatprep.subr.bf16.mxu1 %v1016_v8 }
  0x1b   :  { %959 = vmatpush3.bf16.msra.mxu0 %v1016_v8  ;;  %1008 = vmatpush3.bf16.msra.mxu1 %v1016_v8 }
  0x1c   :  { %960 = vmatprep.subr.bf16.mxu0 %v1017_v9  ;;  %1001 = vmatprep.subr.bf16.mxu1 %v1017_v9 }
  0x1f   :  { %961 = vmatpush3.bf16.msra.mxu0 %v1017_v9  ;;  %1009 = vmatpush3.bf16.msra.mxu1 %v1017_v9 }
  0x22   :  { %963 = vmatmul.mubr.bf16.vlgmr.msra.gmra.mrb[0].mxu0 %v1020_v10  ;;  %979 = vmatmul.mubr.bf16.vlgmr.msra.gmra.mrb[0].mxu1 %v1021_v11 }
  0x23   :  { %966 = vmatprep.mubr.bf16.mxu0 %v1022_v12  ;;  %982 = vmatprep.mubr.bf16.mxu1 %v1023_v13 }
  0x2a   :  { %967 = vmatmul.mubr.bf16.gmra.mrb[4].mxu0 %v1024_v14  ;;  %983 = vmatmul.mubr.bf16.gmra.mrb[4].mxu1 %v1025_v15 }
  0x2b   :  { %970 = vmatprep.mubr.bf16.mxu0 %v1026_v16  ;;  %986 = vmatprep.mubr.bf16.mxu1 %v1027_v17 }
  0x32   :  { %971 = vmatmul.mubr.bf16.gmra.mrb[8].mxu0 %v1028_v18  ;;  %987 = vmatmul.mubr.bf16.gmra.mrb[8].mxu1 %v1029_v19 }
  0x33   :  { %974 = vmatprep.mubr.bf16.mxu0 %v1030_v20  ;;  %990 = vmatprep.mubr.bf16.mxu1 %v1031_v21 }
  0x3a   :  { %975 = vmatmul.mubr.bf16.gmra.mrb[12].mxu0 %v1032_v22  ;;  %991 = vmatmul.mubr.bf16.gmra.mrb[12].mxu1 %v1033_v23 }
  0xf5   :  { %v964_v24 = vpop.f32.mrb[0].mxu0  ;;  %v980_v26 = vpop.f32.mrb[0].mxu1 }
  0xf6   :  { %v309_v27 = vpop.f32.mrb[1].mxu0  ;;  %v373_v28 = vpop.f32.mrb[1].mxu1  ;;  %v544_v31 = vadd.f32 %v964_v24, %v1129_v25  ;;  %v560_v32 = vadd.f32 %v980_v26, %v1129_v25 }
  0xf7   :  { %v965_v29 = vpop.f32.mrb[2].mxu0  ;;  %v981_v30 = vpop.f32.mrb[2].mxu1  ;;  %v542_v37 = vadd.f32 %v1129_v25, %v309_v27  ;;  %v558_v38 = vadd.f32 %v1129_v25, %v373_v28 }
  0xf8   :  { %v545_v33 = vadd.f32 %v965_v29, %v1129_v25  ;;  %v561_v34 = vadd.f32 %v981_v30, %v1129_v25  ;;  %v312_v35 = vpop.f32.mrb[3].mxu0  ;;  %v376_v36 = vpop.f32.mrb[3].mxu1 }
  0xf9   :  { %v543_v39 = vadd.f32 %v1129_v25, %v312_v35  ;;  %v559_v40 = vadd.f32 %v1129_v25, %v376_v36 }
  0xfa   :  { %v835_v41 = vpack.c.bf16 %v545_v33, %v544_v31  ;;  %v875_v42 = vpack.c.bf16 %v561_v34, %v560_v32 }
  0xfb   :  { %v830_v43 = vpack.c.bf16 %v543_v39, %v542_v37  ;;  %v870_v44 = vpack.c.bf16 %v559_v40, %v558_v38 }
  0xfc   :  { %907 = vst [vmem:[%s1214_s3 + $0x8] sm:$0xff] %v835_v41   ;;  %915 = vst [vmem:[%s1214_s3 + $0x48] sm:$0xff] %v875_v42  }
  0xfd   :  { %831 = vst [vmem:[%s1214_s3] sm:$0xff] %v830_v43   ;;  %914 = vst [vmem:[%s1214_s3 + $0x40] sm:$0xff] %v870_v44   ;;  %v968_v45 = vpop.f32.mrb[4].mxu0  ;;  %v984_v46 = vpop.f32.mrb[4].mxu1 }
  0xfe   :  { %v325_v47 = vpop.f32.mrb[5].mxu0  ;;  %v389_v48 = vpop.f32.mrb[5].mxu1  ;;  %v548_v51 = vadd.f32 %v968_v45, %v1129_v25  ;;  %v564_v52 = vadd.f32 %v984_v46, %v1129_v25 }
  0xff   :  { %v969_v49 = vpop.f32.mrb[6].mxu0  ;;  %v985_v50 = vpop.f32.mrb[6].mxu1  ;;  %v546_v57 = vadd.f32 %v1129_v25, %v325_v47  ;;  %v562_v58 = vadd.f32 %v1129_v25, %v389_v48 }
 0x100   :  { %v549_v53 = vadd.f32 %v969_v49, %v1129_v25  ;;  %v565_v54 = vadd.f32 %v985_v50, %v1129_v25  ;;  %v328_v55 = vpop.f32.mrb[7].mxu0  ;;  %v392_v56 = vpop.f32.mrb[7].mxu1 }
 0x101   :  { %v547_v59 = vadd.f32 %v1129_v25, %v328_v55  ;;  %v563_v60 = vadd.f32 %v1129_v25, %v392_v56 }
 0x102   :  { %v845_v61 = vpack.c.bf16 %v549_v53, %v548_v51  ;;  %v885_v62 = vpack.c.bf16 %v565_v54, %v564_v52 }
 0x103   :  { %v840_v63 = vpack.c.bf16 %v547_v59, %v546_v57  ;;  %v880_v0 = vpack.c.bf16 %v563_v60, %v562_v58 }
 0x104   :  { %909 = vst [vmem:[%s1214_s3 + $0x18] sm:$0xff] %v845_v61   ;;  %917 = vst [vmem:[%s1214_s3 + $0x58] sm:$0xff] %v885_v62  }
 0x105   :  { %908 = vst [vmem:[%s1214_s3 + $0x10] sm:$0xff] %v840_v63   ;;  %916 = vst [vmem:[%s1214_s3 + $0x50] sm:$0xff] %v880_v0   ;;  %v972_v1 = vpop.f32.mrb[8].mxu0  ;;  %v988_v2 = vpop.f32.mrb[8].mxu1 }
 0x106   :  { %v341_v3 = vpop.f32.mrb[9].mxu0  ;;  %v405_v4 = vpop.f32.mrb[9].mxu1  ;;  %v552_v7 = vadd.f32 %v972_v1, %v1129_v25  ;;  %v568_v8 = vadd.f32 %v988_v2, %v1129_v25 }
 0x107   :  { %v973_v5 = vpop.f32.mrb[10].mxu0  ;;  %v989_v6 = vpop.f32.mrb[10].mxu1  ;;  %v550_v13 = vadd.f32 %v1129_v25, %v341_v3  ;;  %v566_v14 = vadd.f32 %v1129_v25, %v405_v4 }
 0x108   :  { %v553_v9 = vadd.f32 %v973_v5, %v1129_v25  ;;  %v569_v10 = vadd.f32 %v989_v6, %v1129_v25  ;;  %v344_v11 = vpop.f32.mrb[11].mxu0  ;;  %v408_v12 = vpop.f32.mrb[11].mxu1 }
 0x109   :  { %v551_v15 = vadd.f32 %v1129_v25, %v344_v11  ;;  %v567_v16 = vadd.f32 %v1129_v25, %v408_v12 }
 0x10a   :  { %v855_v17 = vpack.c.bf16 %v553_v9, %v552_v7  ;;  %v895_v18 = vpack.c.bf16 %v569_v10, %v568_v8 }
 0x10b   :  { %v850_v19 = vpack.c.bf16 %v551_v15, %v550_v13  ;;  %v890_v20 = vpack.c.bf16 %v567_v16, %v566_v14 }
 0x10c   :  { %911 = vst [vmem:[%s1214_s3 + $0x28] sm:$0xff] %v855_v17   ;;  %919 = vst [vmem:[%s1214_s3 + $0x68] sm:$0xff] %v895_v18  }
 0x10d   :  { %910 = vst [vmem:[%s1214_s3 + $0x20] sm:$0xff] %v850_v19   ;;  %918 = vst [vmem:[%s1214_s3 + $0x60] sm:$0xff] %v890_v20   ;;  %v976_v21 = vpop.f32.mrb[12].mxu0  ;;  %v992_v22 = vpop.f32.mrb[12].mxu1 }
 0x10e   :  { %v357_v23 = vpop.f32.mrb[13].mxu0  ;;  %v421_v24 = vpop.f32.mrb[13].mxu1  ;;  %v556_v28 = vadd.f32 %v976_v21, %v1129_v25  ;;  %v572_v29 = vadd.f32 %v992_v22, %v1129_v25 }
 0x10f   :  { %v977_v26 = vpop.f32.mrb[14].mxu0  ;;  %v993_v27 = vpop.f32.mrb[14].mxu1  ;;  %v554_v34 = vadd.f32 %v1129_v25, %v357_v23  ;;  %v570_v35 = vadd.f32 %v1129_v25, %v421_v24 }
 0x110   :  { %v557_v30 = vadd.f32 %v977_v26, %v1129_v25  ;;  %v573_v31 = vadd.f32 %v993_v27, %v1129_v25  ;;  %v360_v32 = vpop.f32.mrb[15].mxu0  ;;  %v424_v33 = vpop.f32.mrb[15].mxu1 }
 0x111   :  { %v555_v36 = vadd.f32 %v1129_v25, %v360_v32  ;;  %v571_v37 = vadd.f32 %v1129_v25, %v424_v33 }
 0x112   :  { %v865_v38 = vpack.c.bf16 %v557_v30, %v556_v28  ;;  %v905_v39 = vpack.c.bf16 %v573_v31, %v572_v29 }
 0x113   :  { %v860_v40 = vpack.c.bf16 %v555_v36, %v554_v34  ;;  %v900_v41 = vpack.c.bf16 %v571_v37, %v570_v35 }
 0x114   :  { %913 = vst [vmem:[%s1214_s3 + $0x38] sm:$0xff] %v865_v38   ;;  %921 = vst [vmem:[%s1214_s3 + $0x78] sm:$0xff] %v905_v39  }
 0x115   :  { %912 = vst [vmem:[%s1214_s3 + $0x30] sm:$0xff] %v860_v40   ;;  %920 = vst [vmem:[%s1214_s3 + $0x70] sm:$0xff] %v900_v41  }

// kernel: hgnn_embedding.7
= control target key start
LH: loop header
LB: loop body
LE: loop exit
PB: predicated region body
PF: predicated region fallthrough
CT: control target
= control target key end

     0   :  { %s1223_s1 = inlined_call_operand.vmem [shape: bf16[256,128], index: 1, kind: input, shape index: {}]   ;;  %s1224_s0 = inlined_call_operand.vmem [shape: bf16[256,256], index: 0, kind: input, shape index: {}]   ;;  %s1225_s2 = inlined_call_operand.vmem [shape: f32[256,128], index: 2, kind: output, shape index: {}]  }
   0x1   :  { %v904_v0 = vld [vmem:[%s1223_s1 + $0x40] sm:$0xff]   ;;  %v906_v2 = vld [vmem:[%s1223_s1 + $0x48] sm:$0xff]   ;;  %v908_v4 = vld [vmem:[%s1223_s1 + $0x50] sm:$0xff]  }
   0x2   :  { %v905_v1 = vld [vmem:[%s1223_s1] sm:$0xff]   ;;  %776 = vmatprep.subr.bf16.mxu0 %v904_v0  ;;  %888 = vmatprep.subr.bf16.mxu1 %v904_v0  ;;  %v907_v3 = vld [vmem:[%s1223_s1 + $0x8] sm:$0xff]   ;;  %v909_v5 = vld [vmem:[%s1223_s1 + $0x10] sm:$0xff]  }
   0x3   :  { %777 = vmatpush3.bf16.msra.mxu0 %v905_v1  ;;  %896 = vmatpush3.bf16.msra.mxu1 %v905_v1  ;;  %v910_v6 = vld [vmem:[%s1223_s1 + $0x58] sm:$0xff]   ;;  %v912_v8 = vld [vmem:[%s1223_s1 + $0x60] sm:$0xff]   ;;  %v914_v10 = vld [vmem:[%s1223_s1 + $0x68] sm:$0xff]  }
   0x4   :  { %778 = vmatprep.subr.bf16.mxu0 %v906_v2  ;;  %889 = vmatprep.subr.bf16.mxu1 %v906_v2  ;;  %v911_v7 = vld [vmem:[%s1223_s1 + $0x18] sm:$0xff]   ;;  %v913_v9 = vld [vmem:[%s1223_s1 + $0x20] sm:$0xff]   ;;  %v915_v13 = vld [vmem:[%s1223_s1 + $0x28] sm:$0xff]  }
   0x5   :  { %v922_v11 = vld [vmem:[%s1224_s0 + $0x4] ss:$8 sps:$4 sm:$0xff]   ;;  %v916_v14 = vld [vmem:[%s1223_s1 + $0x70] sm:$0xff]   ;;  %v918_v16 = vld [vmem:[%s1223_s1 + $0x78] sm:$0xff]  }
   0x6   :  { %v925_v12 = vld [vmem:[%s1224_s0 + $0x84] ss:$8 sps:$4 sm:$0xff]   ;;  %432 = vmatprep.mubr.bf16.mxu0 %v922_v11  ;;  %v917_v15 = vld [vmem:[%s1223_s1 + $0x30] sm:$0xff]   ;;  %v919_v17 = vld [vmem:[%s1223_s1 + $0x38] sm:$0xff]  }
   0x7   :  { %779 = vmatpush3.bf16.msra.mxu0 %v907_v3  ;;  %897 = vmatpush3.bf16.msra.mxu1 %v907_v3  ;;  %v920_v18 = vld [vmem:[%s1224_s0] ss:$8 sps:$4 sm:$0xff]   ;;  %v926_v20 = vld [vmem:[%s1224_s0 + $0x14] ss:$8 sps:$4 sm:$0xff]   ;;  %v930_v22 = vld [vmem:[%s1224_s0 + $0x10] ss:$8 sps:$4 sm:$0xff]  }
   0x8   :  { %780 = vmatprep.subr.bf16.mxu0 %v908_v4  ;;  %890 = vmatprep.subr.bf16.mxu1 %v908_v4  ;;  %v923_v19 = vld [vmem:[%s1224_s0 + $0x80] ss:$8 sps:$4 sm:$0xff]   ;;  %v928_v21 = vld [vmem:[%s1224_s0 + $0x94] ss:$8 sps:$4 sm:$0xff]   ;;  %v931_v23 = vld [vmem:[%s1224_s0 + $0x90] ss:$8 sps:$4 sm:$0xff]  }
   0x9   :  { %496 = vmatprep.mubr.bf16.mxu1 %v925_v12  ;;  %v932_v24 = vld [vmem:[%s1224_s0 + $0x24] ss:$8 sps:$4 sm:$0xff]   ;;  %v936_v26 = vld [vmem:[%s1224_s0 + $0x20] ss:$8 sps:$4 sm:$0xff]   ;;  %v938_v28 = vld [vmem:[%s1224_s0 + $0x34] ss:$8 sps:$4 sm:$0xff]  }
   0xa   :  { %v934_v25 = vld [vmem:[%s1224_s0 + $0xa4] ss:$8 sps:$4 sm:$0xff]   ;;  %v937_v27 = vld [vmem:[%s1224_s0 + $0xa0] ss:$8 sps:$4 sm:$0xff]   ;;  %v940_v29 = vld [vmem:[%s1224_s0 + $0xb4] ss:$8 sps:$4 sm:$0xff]  }
   0xb   :  { %781 = vmatpush3.bf16.msra.mxu0 %v909_v5  ;;  %898 = vmatpush3.bf16.msra.mxu1 %v909_v5  ;;  %v942_v30 = vld [vmem:[%s1224_s0 + $0x30] ss:$8 sps:$4 sm:$0xff]   ;;  %v944_v32 = vld [vmem:[%s1224_s0 + $0x44] ss:$8 sps:$4 sm:$0xff]   ;;  %v948_v34 = vld [vmem:[%s1224_s0 + $0x40] ss:$8 sps:$4 sm:$0xff]  }
   0xc   :  { %782 = vmatprep.subr.bf16.mxu0 %v910_v6  ;;  %891 = vmatprep.subr.bf16.mxu1 %v910_v6  ;;  %v943_v31 = vld [vmem:[%s1224_s0 + $0xb0] ss:$8 sps:$4 sm:$0xff]   ;;  %v946_v33 = vld [vmem:[%s1224_s0 + $0xc4] ss:$8 sps:$4 sm:$0xff]   ;;  %v949_v35 = vld [vmem:[%s1224_s0 + $0xc0] ss:$8 sps:$4 sm:$0xff]  }
   0xd   :  { %v950_v36 = vld [vmem:[%s1224_s0 + $0x54] ss:$8 sps:$4 sm:$0xff]   ;;  %v954_v38 = vld [vmem:[%s1224_s0 + $0x50] ss:$8 sps:$4 sm:$0xff]   ;;  %v956_v40 = vld [vmem:[%s1224_s0 + $0x64] ss:$8 sps:$4 sm:$0xff]  }
   0xe   :  { %v952_v37 = vld [vmem:[%s1224_s0 + $0xd4] ss:$8 sps:$4 sm:$0xff]   ;;  %v955_v39 = vld [vmem:[%s1224_s0 + $0xd0] ss:$8 sps:$4 sm:$0xff]   ;;  %v958_v41 = vld [vmem:[%s1224_s0 + $0xe4] ss:$8 sps:$4 sm:$0xff]  }
   0xf   :  { %783 = vmatpush3.bf16.msra.mxu0 %v911_v7  ;;  %899 = vmatpush3.bf16.msra.mxu1 %v911_v7  ;;  %v960_v42 = vld [vmem:[%s1224_s0 + $0x60] ss:$8 sps:$4 sm:$0xff]   ;;  %v962_v44 = vld [vmem:[%s1224_s0 + $0x74] ss:$8 sps:$4 sm:$0xff]   ;;  %v966_v46 = vld [vmem:[%s1224_s0 + $0x70] ss:$8 sps:$4 sm:$0xff]  }
  0x10   :  { %784 = vmatprep.subr.bf16.mxu0 %v912_v8  ;;  %892 = vmatprep.subr.bf16.mxu1 %v912_v8  ;;  %v961_v43 = vld [vmem:[%s1224_s0 + $0xe0] ss:$8 sps:$4 sm:$0xff]   ;;  %v964_v45 = vld [vmem:[%s1224_s0 + $0xf4] ss:$8 sps:$4 sm:$0xff]   ;;  %v967_v47 = vld [vmem:[%s1224_s0 + $0xf0] ss:$8 sps:$4 sm:$0xff]  }
  0x13   :  { %785 = vmatpush3.bf16.msra.mxu0 %v913_v9  ;;  %900 = vmatpush3.bf16.msra.mxu1 %v913_v9 }
  0x14   :  { %786 = vmatprep.subr.bf16.mxu0 %v914_v10  ;;  %893 = vmatprep.subr.bf16.mxu1 %v914_v10 }
  0x17   :  { %787 = vmatpush3.bf16.msra.mxu0 %v915_v13  ;;  %901 = vmatpush3.bf16.msra.mxu1 %v915_v13 }
  0x18   :  { %788 = vmatprep.subr.bf16.mxu0 %v916_v14  ;;  %894 = vmatprep.subr.bf16.mxu1 %v916_v14 }
  0x1b   :  { %789 = vmatpush3.bf16.msra.mxu0 %v917_v15  ;;  %902 = vmatpush3.bf16.msra.mxu1 %v917_v15 }
  0x1c   :  { %790 = vmatprep.subr.bf16.mxu0 %v918_v16  ;;  %895 = vmatprep.subr.bf16.mxu1 %v918_v16 }
  0x1f   :  { %791 = vmatpush3.bf16.msra.mxu0 %v919_v17  ;;  %903 = vmatpush3.bf16.msra.mxu1 %v919_v17 }
  0x22   :  { %433 = vmatmul.mubr.bf16.vlgmr.msra.gmra.mrb[0].mxu0 %v920_v18  ;;  %497 = vmatmul.mubr.bf16.vlgmr.msra.gmra.mrb[0].mxu1 %v923_v19 }
  0x23   :  { %440 = vmatprep.mubr.bf16.mxu0 %v926_v20  ;;  %504 = vmatprep.mubr.bf16.mxu1 %v928_v21 }
  0x2a   :  { %441 = vmatmul.mubr.bf16.gmra.mrb[4].mxu0 %v930_v22  ;;  %505 = vmatmul.mubr.bf16.gmra.mrb[4].mxu1 %v931_v23 }
  0x2b   :  { %448 = vmatprep.mubr.bf16.mxu0 %v932_v24  ;;  %512 = vmatprep.mubr.bf16.mxu1 %v934_v25 }
  0x32   :  { %449 = vmatmul.mubr.bf16.gmra.mrb[8].mxu0 %v936_v26  ;;  %513 = vmatmul.mubr.bf16.gmra.mrb[8].mxu1 %v937_v27 }
  0x33   :  { %456 = vmatprep.mubr.bf16.mxu0 %v938_v28  ;;  %520 = vmatprep.mubr.bf16.mxu1 %v940_v29 }
  0x3a   :  { %457 = vmatmul.mubr.bf16.gmra.mrb[12].mxu0 %v942_v30  ;;  %521 = vmatmul.mubr.bf16.gmra.mrb[12].mxu1 %v943_v31 }
  0x3b   :  { %464 = vmatprep.mubr.bf16.mxu0 %v944_v32  ;;  %528 = vmatprep.mubr.bf16.mxu1 %v946_v33 }
  0x42   :  { %465 = vmatmul.mubr.bf16.gmra.mrb[16].mxu0 %v948_v34  ;;  %529 = vmatmul.mubr.bf16.gmra.mrb[16].mxu1 %v949_v35 }
  0x43   :  { %472 = vmatprep.mubr.bf16.mxu0 %v950_v36  ;;  %536 = vmatprep.mubr.bf16.mxu1 %v952_v37 }
  0x4a   :  { %473 = vmatmul.mubr.bf16.gmra.mrb[20].mxu0 %v954_v38  ;;  %537 = vmatmul.mubr.bf16.gmra.mrb[20].mxu1 %v955_v39 }
  0x4b   :  { %480 = vmatprep.mubr.bf16.mxu0 %v956_v40  ;;  %544 = vmatprep.mubr.bf16.mxu1 %v958_v41 }
  0x52   :  { %481 = vmatmul.mubr.bf16.gmra.mrb[24].mxu0 %v960_v42  ;;  %545 = vmatmul.mubr.bf16.gmra.mrb[24].mxu1 %v961_v43 }
  0x53   :  { %488 = vmatprep.mubr.bf16.mxu0 %v962_v44  ;;  %552 = vmatprep.mubr.bf16.mxu1 %v964_v45 }
  0x5a   :  { %489 = vmatmul.mubr.bf16.gmra.mrb[28].mxu0 %v966_v46  ;;  %553 = vmatmul.mubr.bf16.gmra.mrb[28].mxu1 %v967_v47 }
  0xf5   :  { %v792_v48 = vpop.f32.mrb[0].mxu0  ;;  %v840_v49 = vpop.f32.mrb[0].mxu1 }
  0xf6   :  { %v793_v50 = vpop.f32.mrb[1].mxu0  ;;  %v841_v51 = vpop.f32.mrb[1].mxu1 }
  0xf7   :  { %v794_v52 = vadd.f32 %v793_v50, %v792_v48  ;;  %v842_v53 = vadd.f32 %v841_v51, %v840_v49  ;;  %v795_v54 = vpop.f32.mrb[2].mxu0  ;;  %v843_v55 = vpop.f32.mrb[2].mxu1 }
  0xf8   :  { %v796_v56 = vpop.f32.mrb[3].mxu0  ;;  %v844_v57 = vpop.f32.mrb[3].mxu1 }
  0xf9   :  { %v660_v58 = vmax.f32 %v794_v52, 0.0  ;;  %v676_v59 = vmax.f32 %v842_v53, 0.0  ;;  %v797_v60 = vadd.f32 %v796_v56, %v795_v54  ;;  %v845_v61 = vadd.f32 %v844_v57, %v843_v55 }
  0xfb   :  { %692 = vst [vmem:[%s1225_s2] sm:$0xff] %v660_v58  ;;  %708 = vst [vmem:[%s1225_s2 + $0x80] sm:$0xff] %v676_v59  ;;  %v661_v62 = vmax.f32 %v797_v60, 0.0  ;;  %v677_v63 = vmax.f32 %v845_v61, 0.0 }
  0xfd   :  { %693 = vst [vmem:[%s1225_s2 + $0x8] sm:$0xff] %v661_v62  ;;  %709 = vst [vmem:[%s1225_s2 + $0x88] sm:$0xff] %v677_v63  ;;  %v798_v0 = vpop.f32.mrb[4].mxu0  ;;  %v846_v1 = vpop.f32.mrb[4].mxu1 }
  0xfe   :  { %v799_v2 = vpop.f32.mrb[5].mxu0  ;;  %v847_v3 = vpop.f32.mrb[5].mxu1 }
  0xff   :  { %v800_v4 = vadd.f32 %v799_v2, %v798_v0  ;;  %v848_v5 = vadd.f32 %v847_v3, %v846_v1  ;;  %v801_v6 = vpop.f32.mrb[6].mxu0  ;;  %v849_v7 = vpop.f32.mrb[6].mxu1 }
 0x100   :  { %v802_v8 = vpop.f32.mrb[7].mxu0  ;;  %v850_v9 = vpop.f32.mrb[7].mxu1 }
 0x101   :  { %v662_v10 = vmax.f32 %v800_v4, 0.0  ;;  %v678_v11 = vmax.f32 %v848_v5, 0.0  ;;  %v803_v12 = vadd.f32 %v802_v8, %v801_v6  ;;  %v851_v13 = vadd.f32 %v850_v9, %v849_v7 }
 0x103   :  { %694 = vst [vmem:[%s1225_s2 + $0x10] sm:$0xff] %v662_v10  ;;  %710 = vst [vmem:[%s1225_s2 + $0x90] sm:$0xff] %v678_v11  ;;  %v663_v14 = vmax.f32 %v803_v12, 0.0  ;;  %v679_v15 = vmax.f32 %v851_v13, 0.0 }
 0x105   :  { %695 = vst [vmem:[%s1225_s2 + $0x18] sm:$0xff] %v663_v14  ;;  %711 = vst [vmem:[%s1225_s2 + $0x98] sm:$0xff] %v679_v15  ;;  %v804_v16 = vpop.f32.mrb[8].mxu0  ;;  %v852_v17 = vpop.f32.mrb[8].mxu1 }
 0x106   :  { %v805_v18 = vpop.f32.mrb[9].mxu0  ;;  %v853_v19 = vpop.f32.mrb[9].mxu1 }
 0x107   :  { %v806_v20 = vadd.f32 %v805_v18, %v804_v16  ;;  %v854_v21 = vadd.f32 %v853_v19, %v852_v17  ;;  %v807_v22 = vpop.f32.mrb[10].mxu0  ;;  %v855_v23 = vpop.f32.mrb[10].mxu1 }
 0x108   :  { %v808_v24 = vpop.f32.mrb[11].mxu0  ;;  %v856_v25 = vpop.f32.mrb[11].mxu1 }
 0x109   :  { %v664_v26 = vmax.f32 %v806_v20, 0.0  ;;  %v680_v27 = vmax.f32 %v854_v21, 0.0  ;;  %v809_v28 = vadd.f32 %v808_v24, %v807_v22  ;;  %v857_v29 = vadd.f32 %v856_v25, %v855_v23 }
 0x10b   :  { %696 = vst [vmem:[%s1225_s2 + $0x20] sm:$0xff] %v664_v26  ;;  %712 = vst [vmem:[%s1225_s2 + $0xa0] sm:$0xff] %v680_v27  ;;  %v665_v30 = vmax.f32 %v809_v28, 0.0  ;;  %v681_v31 = vmax.f32 %v857_v29, 0.0 }
 0x10d   :  { %697 = vst [vmem:[%s1225_s2 + $0x28] sm:$0xff] %v665_v30  ;;  %713 = vst [vmem:[%s1225_s2 + $0xa8] sm:$0xff] %v681_v31  ;;  %v810_v32 = vpop.f32.mrb[12].mxu0  ;;  %v858_v33 = vpop.f32.mrb[12].mxu1 }
 0x10e   :  { %v811_v34 = vpop.f32.mrb[13].mxu0  ;;  %v859_v35 = vpop.f32.mrb[13].mxu1 }
 0x10f   :  { %v812_v36 = vadd.f32 %v811_v34, %v810_v32  ;;  %v860_v37 = vadd.f32 %v859_v35, %v858_v33  ;;  %v813_v38 = vpop.f32.mrb[14].mxu0  ;;  %v861_v39 = vpop.f32.mrb[14].mxu1 }
 0x110   :  { %v814_v40 = vpop.f32.mrb[15].mxu0  ;;  %v862_v41 = vpop.f32.mrb[15].mxu1 }
 0x111   :  { %v666_v42 = vmax.f32 %v812_v36, 0.0  ;;  %v682_v43 = vmax.f32 %v860_v37, 0.0  ;;  %v815_v44 = vadd.f32 %v814_v40, %v813_v38  ;;  %v863_v45 = vadd.f32 %v862_v41, %v861_v39 }
 0x113   :  { %698 = vst [vmem:[%s1225_s2 + $0x30] sm:$0xff] %v666_v42  ;;  %714 = vst [vmem:[%s1225_s2 + $0xb0] sm:$0xff] %v682_v43  ;;  %v667_v46 = vmax.f32 %v815_v44, 0.0  ;;  %v683_v47 = vmax.f32 %v863_v45, 0.0 }
 0x115   :  { %699 = vst [vmem:[%s1225_s2 + $0x38] sm:$0xff] %v667_v46  ;;  %715 = vst [vmem:[%s1225_s2 + $0xb8] sm:$0xff] %v683_v47  ;;  %v816_v48 = vpop.f32.mrb[16].mxu0  ;;  %v864_v49 = vpop.f32.mrb[16].mxu1 }
 0x116   :  { %v817_v50 = vpop.f32.mrb[17].mxu0  ;;  %v865_v51 = vpop.f32.mrb[17].mxu1 }
 0x117   :  { %v818_v52 = vadd.f32 %v817_v50, %v816_v48  ;;  %v866_v53 = vadd.f32 %v865_v51, %v864_v49  ;;  %v819_v54 = vpop.f32.mrb[18].mxu0  ;;  %v867_v55 = vpop.f32.mrb[18].mxu1 }
 0x118   :  { %v820_v56 = vpop.f32.mrb[19].mxu0  ;;  %v868_v57 = vpop.f32.mrb[19].mxu1 }
 0x119   :  { %v668_v58 = vmax.f32 %v818_v52, 0.0  ;;  %v684_v59 = vmax.f32 %v866_v53, 0.0  ;;  %v821_v60 = vadd.f32 %v820_v56, %v819_v54  ;;  %v869_v61 = vadd.f32 %v868_v57, %v867_v55 }
 0x11b   :  { %700 = vst [vmem:[%s1225_s2 + $0x40] sm:$0xff] %v668_v58  ;;  %716 = vst [vmem:[%s1225_s2 + $0xc0] sm:$0xff] %v684_v59  ;;  %v669_v62 = vmax.f32 %v821_v60, 0.0  ;;  %v685_v63 = vmax.f32 %v869_v61, 0.0 }
 0x11d   :  { %701 = vst [vmem:[%s1225_s2 + $0x48] sm:$0xff] %v669_v62  ;;  %717 = vst [vmem:[%s1225_s2 + $0xc8] sm:$0xff] %v685_v63  ;;  %v822_v0 = vpop.f32.mrb[20].mxu0  ;;  %v870_v1 = vpop.f32.mrb[20].mxu1 }
 0x11e   :  { %v823_v2 = vpop.f32.mrb[21].mxu0  ;;  %v871_v3 = vpop.f32.mrb[21].mxu1 }
 0x11f   :  { %v824_v4 = vadd.f32 %v823_v2, %v822_v0  ;;  %v872_v5 = vadd.f32 %v871_v3, %v870_v1  ;;  %v825_v6 = vpop.f32.mrb[22].mxu0  ;;  %v873_v7 = vpop.f32.mrb[22].mxu1 }
 0x120   :  { %v826_v8 = vpop.f32.mrb[23].mxu0  ;;  %v874_v9 = vpop.f32.mrb[23].mxu1 }
 0x121   :  { %v670_v10 = vmax.f32 %v824_v4, 0.0  ;;  %v686_v11 = vmax.f32 %v872_v5, 0.0  ;;  %v827_v12 = vadd.f32 %v826_v8, %v825_v6  ;;  %v875_v13 = vadd.f32 %v874_v9, %v873_v7 }
 0x123   :  { %702 = vst [vmem:[%s1225_s2 + $0x50] sm:$0xff] %v670_v10  ;;  %718 = vst [vmem:[%s1225_s2 + $0xd0] sm:$0xff] %v686_v11  ;;  %v671_v14 = vmax.f32 %v827_v12, 0.0  ;;  %v687_v15 = vmax.f32 %v875_v13, 0.0 }
 0x125   :  { %703 = vst [vmem:[%s1225_s2 + $0x58] sm:$0xff] %v671_v14  ;;  %719 = vst [vmem:[%s1225_s2 + $0xd8] sm:$0xff] %v687_v15  ;;  %v828_v16 = vpop.f32.mrb[24].mxu0  ;;  %v876_v17 = vpop.f32.mrb[24].mxu1 }
 0x126   :  { %v829_v18 = vpop.f32.mrb[25].mxu0  ;;  %v877_v19 = vpop.f32.mrb[25].mxu1 }
 0x127   :  { %v830_v20 = vadd.f32 %v829_v18, %v828_v16  ;;  %v878_v21 = vadd.f32 %v877_v19, %v876_v17  ;;  %v831_v22 = vpop.f32.mrb[26].mxu0  ;;  %v879_v23 = vpop.f32.mrb[26].mxu1 }
 0x128   :  { %v832_v24 = vpop.f32.mrb[27].mxu0  ;;  %v880_v25 = vpop.f32.mrb[27].mxu1 }
 0x129   :  { %v672_v26 = vmax.f32 %v830_v20, 0.0  ;;  %v688_v27 = vmax.f32 %v878_v21, 0.0  ;;  %v833_v28 = vadd.f32 %v832_v24, %v831_v22  ;;  %v881_v29 = vadd.f32 %v880_v25, %v879_v23 }
 0x12b   :  { %704 = vst [vmem:[%s1225_s2 + $0x60] sm:$0xff] %v672_v26  ;;  %720 = vst [vmem:[%s1225_s2 + $0xe0] sm:$0xff] %v688_v27  ;;  %v673_v30 = vmax.f32 %v833_v28, 0.0  ;;  %v689_v31 = vmax.f32 %v881_v29, 0.0 }
 0x12d   :  { %705 = vst [vmem:[%s1225_s2 + $0x68] sm:$0xff] %v673_v30  ;;  %721 = vst [vmem:[%s1225_s2 + $0xe8] sm:$0xff] %v689_v31  ;;  %v834_v32 = vpop.f32.mrb[28].mxu0  ;;  %v882_v33 = vpop.f32.mrb[28].mxu1 }
 0x12e   :  { %v835_v34 = vpop.f32.mrb[29].mxu0  ;;  %v883_v35 = vpop.f32.mrb[29].mxu1 }
 0x12f   :  { %v836_v36 = vadd.f32 %v835_v34, %v834_v32  ;;  %v884_v37 = vadd.f32 %v883_v35, %v882_v33  ;;  %v837_v38 = vpop.f32.mrb[30].mxu0  ;;  %v885_v39 = vpop.f32.mrb[30].mxu1 }
 0x130   :  { %v838_v40 = vpop.f32.mrb[31].mxu0  ;;  %v886_v41 = vpop.f32.mrb[31].mxu1 }
 0x131   :  { %v674_v42 = vmax.f32 %v836_v36, 0.0  ;;  %v690_v43 = vmax.f32 %v884_v37, 0.0  ;;  %v839_v44 = vadd.f32 %v838_v40, %v837_v38  ;;  %v887_v45 = vadd.f32 %v886_v41, %v885_v39 }
 0x133   :  { %706 = vst [vmem:[%s1225_s2 + $0x70] sm:$0xff] %v674_v42  ;;  %722 = vst [vmem:[%s1225_s2 + $0xf0] sm:$0xff] %v690_v43  ;;  %v675_v46 = vmax.f32 %v839_v44, 0.0  ;;  %v691_v47 = vmax.f32 %v887_v45, 0.0 }
 0x135   :  { %707 = vst [vmem:[%s1225_s2 + $0x78] sm:$0xff] %v675_v46  ;;  %723 = vst [vmem:[%s1225_s2 + $0xf8] sm:$0xff] %v691_v47 }

// kernel: hgnn_embedding.5
= control target key start
LH: loop header
LB: loop body
LE: loop exit
PB: predicated region body
PF: predicated region fallthrough
CT: control target
= control target key end

     0   :  { %s1630_s1 = inlined_call_operand.vmem [shape: bf16[256,128], index: 1, kind: input, shape index: {}]   ;;  %s1631_s0 = inlined_call_operand.vmem [shape: bf16[256,256], index: 0, kind: input, shape index: {}]   ;;  %s1632_s2 = inlined_call_operand.vmem [shape: f32[256,128], index: 2, kind: input, shape index: {}]   ;;  %s1633_s3 = inlined_call_operand.vmem [shape: bf16[256,128], index: 3, kind: output, shape index: {}]  }
   0x1   :  { %v1258_v0 = vld [vmem:[%s1630_s1 + $0x40] sm:$0xff]   ;;  %v1260_v2 = vld [vmem:[%s1630_s1 + $0x48] sm:$0xff]   ;;  %v1262_v4 = vld [vmem:[%s1630_s1 + $0x50] sm:$0xff]  }
   0x2   :  { %v1259_v1 = vld [vmem:[%s1630_s1] sm:$0xff]   ;;  %1130 = vmatprep.subr.bf16.mxu0 %v1258_v0  ;;  %1242 = vmatprep.subr.bf16.mxu1 %v1258_v0  ;;  %v1261_v3 = vld [vmem:[%s1630_s1 + $0x8] sm:$0xff]   ;;  %v1263_v5 = vld [vmem:[%s1630_s1 + $0x10] sm:$0xff]  }
   0x3   :  { %1131 = vmatpush3.bf16.msra.mxu0 %v1259_v1  ;;  %1250 = vmatpush3.bf16.msra.mxu1 %v1259_v1  ;;  %v1264_v6 = vld [vmem:[%s1630_s1 + $0x58] sm:$0xff]   ;;  %v1266_v8 = vld [vmem:[%s1630_s1 + $0x60] sm:$0xff]   ;;  %v1268_v10 = vld [vmem:[%s1630_s1 + $0x68] sm:$0xff]  }
   0x4   :  { %1132 = vmatprep.subr.bf16.mxu0 %v1260_v2  ;;  %1243 = vmatprep.subr.bf16.mxu1 %v1260_v2  ;;  %v1265_v7 = vld [vmem:[%s1630_s1 + $0x18] sm:$0xff]   ;;  %v1267_v9 = vld [vmem:[%s1630_s1 + $0x20] sm:$0xff]   ;;  %v1269_v13 = vld [vmem:[%s1630_s1 + $0x28] sm:$0xff]  }
   0x5   :  { %v1276_v11 = vld [vmem:[%s1631_s0 + $0x4] ss:$8 sps:$4 sm:$0xff]   ;;  %v1270_v14 = vld [vmem:[%s1630_s1 + $0x70] sm:$0xff]   ;;  %v1272_v16 = vld [vmem:[%s1630_s1 + $0x78] sm:$0xff]  }
   0x6   :  { %v1279_v12 = vld [vmem:[%s1631_s0 + $0x84] ss:$8 sps:$4 sm:$0xff]   ;;  %435 = vmatprep.mubr.bf16.mxu0 %v1276_v11  ;;  %v1271_v15 = vld [vmem:[%s1630_s1 + $0x30] sm:$0xff]   ;;  %v1273_v17 = vld [vmem:[%s1630_s1 + $0x38] sm:$0xff]  }
   0x7   :  { %1133 = vmatpush3.bf16.msra.mxu0 %v1261_v3  ;;  %1251 = vmatpush3.bf16.msra.mxu1 %v1261_v3  ;;  %v1274_v18 = vld [vmem:[%s1631_s0] ss:$8 sps:$4 sm:$0xff]   ;;  %v1280_v20 = vld [vmem:[%s1631_s0 + $0x14] ss:$8 sps:$4 sm:$0xff]   ;;  %v1284_v22 = vld [vmem:[%s1631_s0 + $0x10] ss:$8 sps:$4 sm:$0xff]  }
   0x8   :  { %1134 = vmatprep.subr.bf16.mxu0 %v1262_v4  ;;  %1244 = vmatprep.subr.bf16.mxu1 %v1262_v4  ;;  %v1277_v19 = vld [vmem:[%s1631_s0 + $0x80] ss:$8 sps:$4 sm:$0xff]   ;;  %v1282_v21 = vld [vmem:[%s1631_s0 + $0x94] ss:$8 sps:$4 sm:$0xff]   ;;  %v1285_v23 = vld [vmem:[%s1631_s0 + $0x90] ss:$8 sps:$4 sm:$0xff]  }
   0x9   :  { %499 = vmatprep.mubr.bf16.mxu1 %v1279_v12  ;;  %v1286_v24 = vld [vmem:[%s1631_s0 + $0x24] ss:$8 sps:$4 sm:$0xff]   ;;  %v1290_v26 = vld [vmem:[%s1631_s0 + $0x20] ss:$8 sps:$4 sm:$0xff]   ;;  %v1292_v28 = vld [vmem:[%s1631_s0 + $0x34] ss:$8 sps:$4 sm:$0xff]  }
   0xa   :  { %v1288_v25 = vld [vmem:[%s1631_s0 + $0xa4] ss:$8 sps:$4 sm:$0xff]   ;;  %v1291_v27 = vld [vmem:[%s1631_s0 + $0xa0] ss:$8 sps:$4 sm:$0xff]   ;;  %v1294_v29 = vld [vmem:[%s1631_s0 + $0xb4] ss:$8 sps:$4 sm:$0xff]  }
   0xb   :  { %1135 = vmatpush3.bf16.msra.mxu0 %v1263_v5  ;;  %1252 = vmatpush3.bf16.msra.mxu1 %v1263_v5  ;;  %v1296_v30 = vld [vmem:[%s1631_s0 + $0x30] ss:$8 sps:$4 sm:$0xff]   ;;  %v1298_v32 = vld [vmem:[%s1631_s0 + $0x44] ss:$8 sps:$4 sm:$0xff]   ;;  %v1302_v34 = vld [vmem:[%s1631_s0 + $0x40] ss:$8 sps:$4 sm:$0xff]  }
   0xc   :  { %1136 = vmatprep.subr.bf16.mxu0 %v1264_v6  ;;  %1245 = vmatprep.subr.bf16.mxu1 %v1264_v6  ;;  %v1297_v31 = vld [vmem:[%s1631_s0 + $0xb0] ss:$8 sps:$4 sm:$0xff]   ;;  %v1300_v33 = vld [vmem:[%s1631_s0 + $0xc4] ss:$8 sps:$4 sm:$0xff]   ;;  %v1303_v35 = vld [vmem:[%s1631_s0 + $0xc0] ss:$8 sps:$4 sm:$0xff]  }
   0xd   :  { %v1304_v36 = vld [vmem:[%s1631_s0 + $0x54] ss:$8 sps:$4 sm:$0xff]   ;;  %v1308_v38 = vld [vmem:[%s1631_s0 + $0x50] ss:$8 sps:$4 sm:$0xff]   ;;  %v1310_v40 = vld [vmem:[%s1631_s0 + $0x64] ss:$8 sps:$4 sm:$0xff]  }
   0xe   :  { %v1306_v37 = vld [vmem:[%s1631_s0 + $0xd4] ss:$8 sps:$4 sm:$0xff]   ;;  %v1309_v39 = vld [vmem:[%s1631_s0 + $0xd0] ss:$8 sps:$4 sm:$0xff]   ;;  %v1312_v41 = vld [vmem:[%s1631_s0 + $0xe4] ss:$8 sps:$4 sm:$0xff]  }
   0xf   :  { %1137 = vmatpush3.bf16.msra.mxu0 %v1265_v7  ;;  %1253 = vmatpush3.bf16.msra.mxu1 %v1265_v7  ;;  %v1314_v42 = vld [vmem:[%s1631_s0 + $0x60] ss:$8 sps:$4 sm:$0xff]   ;;  %v1316_v44 = vld [vmem:[%s1631_s0 + $0x74] ss:$8 sps:$4 sm:$0xff]   ;;  %v1320_v46 = vld [vmem:[%s1631_s0 + $0x70] ss:$8 sps:$4 sm:$0xff]  }
  0x10   :  { %1138 = vmatprep.subr.bf16.mxu0 %v1266_v8  ;;  %1246 = vmatprep.subr.bf16.mxu1 %v1266_v8  ;;  %v1315_v43 = vld [vmem:[%s1631_s0 + $0xe0] ss:$8 sps:$4 sm:$0xff]   ;;  %v1318_v45 = vld [vmem:[%s1631_s0 + $0xf4] ss:$8 sps:$4 sm:$0xff]   ;;  %v1321_v47 = vld [vmem:[%s1631_s0 + $0xf0] ss:$8 sps:$4 sm:$0xff]  }
  0x11   :  { %v695_v59 = vld [vmem:[%s1632_s2] sm:$0xff]  ;;  %v696_v0 = vld [vmem:[%s1632_s2 + $0x8] sm:$0xff] }
  0x12   :  { %v711_v63 = vld [vmem:[%s1632_s2 + $0x80] sm:$0xff]  ;;  %v712_v1 = vld [vmem:[%s1632_s2 + $0x88] sm:$0xff] }
  0x13   :  { %1139 = vmatpush3.bf16.msra.mxu0 %v1267_v9  ;;  %1254 = vmatpush3.bf16.msra.mxu1 %v1267_v9 }
  0x14   :  { %1140 = vmatprep.subr.bf16.mxu0 %v1268_v10  ;;  %1247 = vmatprep.subr.bf16.mxu1 %v1268_v10 }
  0x17   :  { %1141 = vmatpush3.bf16.msra.mxu0 %v1269_v13  ;;  %1255 = vmatpush3.bf16.msra.mxu1 %v1269_v13 }
  0x18   :  { %1142 = vmatprep.subr.bf16.mxu0 %v1270_v14  ;;  %1248 = vmatprep.subr.bf16.mxu1 %v1270_v14 }
  0x1b   :  { %1143 = vmatpush3.bf16.msra.mxu0 %v1271_v15  ;;  %1256 = vmatpush3.bf16.msra.mxu1 %v1271_v15 }
  0x1c   :  { %1144 = vmatprep.subr.bf16.mxu0 %v1272_v16  ;;  %1249 = vmatprep.subr.bf16.mxu1 %v1272_v16 }
  0x1f   :  { %1145 = vmatpush3.bf16.msra.mxu0 %v1273_v17  ;;  %1257 = vmatpush3.bf16.msra.mxu1 %v1273_v17 }
  0x22   :  { %436 = vmatmul.mubr.bf16.vlgmr.msra.gmra.mrb[0].mxu0 %v1274_v18  ;;  %500 = vmatmul.mubr.bf16.vlgmr.msra.gmra.mrb[0].mxu1 %v1277_v19 }
  0x23   :  { %443 = vmatprep.mubr.bf16.mxu0 %v1280_v20  ;;  %507 = vmatprep.mubr.bf16.mxu1 %v1282_v21  ;;  %v697_v21 = vld [vmem:[%s1632_s2 + $0x10] sm:$0xff] }
  0x2a   :  { %444 = vmatmul.mubr.bf16.gmra.mrb[4].mxu0 %v1284_v22  ;;  %508 = vmatmul.mubr.bf16.gmra.mrb[4].mxu1 %v1285_v23 }
  0x2b   :  { %451 = vmatprep.mubr.bf16.mxu0 %v1286_v24  ;;  %515 = vmatprep.mubr.bf16.mxu1 %v1288_v25  ;;  %v713_v25 = vld [vmem:[%s1632_s2 + $0x90] sm:$0xff] }
  0x32   :  { %452 = vmatmul.mubr.bf16.gmra.mrb[8].mxu0 %v1290_v26  ;;  %516 = vmatmul.mubr.bf16.gmra.mrb[8].mxu1 %v1291_v27  ;;  %v698_v26 = vld [vmem:[%s1632_s2 + $0x18] sm:$0xff] }
  0x33   :  { %459 = vmatprep.mubr.bf16.mxu0 %v1292_v28  ;;  %523 = vmatprep.mubr.bf16.mxu1 %v1294_v29  ;;  %v714_v27 = vld [vmem:[%s1632_s2 + $0x98] sm:$0xff] }
  0x3a   :  { %460 = vmatmul.mubr.bf16.gmra.mrb[12].mxu0 %v1296_v30  ;;  %524 = vmatmul.mubr.bf16.gmra.mrb[12].mxu1 %v1297_v31 }
  0x3b   :  { %467 = vmatprep.mubr.bf16.mxu0 %v1298_v32  ;;  %531 = vmatprep.mubr.bf16.mxu1 %v1300_v33 }
  0x42   :  { %468 = vmatmul.mubr.bf16.gmra.mrb[16].mxu0 %v1302_v34  ;;  %532 = vmatmul.mubr.bf16.gmra.mrb[16].mxu1 %v1303_v35 }
  0x43   :  { %475 = vmatprep.mubr.bf16.mxu0 %v1304_v36  ;;  %539 = vmatprep.mubr.bf16.mxu1 %v1306_v37 }
  0x4a   :  { %476 = vmatmul.mubr.bf16.gmra.mrb[20].mxu0 %v1308_v38  ;;  %540 = vmatmul.mubr.bf16.gmra.mrb[20].mxu1 %v1309_v39 }
  0x4b   :  { %483 = vmatprep.mubr.bf16.mxu0 %v1310_v40  ;;  %547 = vmatprep.mubr.bf16.mxu1 %v1312_v41 }
  0x52   :  { %484 = vmatmul.mubr.bf16.gmra.mrb[24].mxu0 %v1314_v42  ;;  %548 = vmatmul.mubr.bf16.gmra.mrb[24].mxu1 %v1315_v43 }
  0x53   :  { %491 = vmatprep.mubr.bf16.mxu0 %v1316_v44  ;;  %555 = vmatprep.mubr.bf16.mxu1 %v1318_v45 }
  0x5a   :  { %492 = vmatmul.mubr.bf16.gmra.mrb[28].mxu0 %v1320_v46  ;;  %556 = vmatmul.mubr.bf16.gmra.mrb[28].mxu1 %v1321_v47  ;;  %v699_v47 = vld [vmem:[%s1632_s2 + $0x20] sm:$0xff] }
  0xf5   :  { %v1146_v48 = vpop.f32.mrb[0].mxu0  ;;  %v1194_v49 = vpop.f32.mrb[0].mxu1 }
  0xf6   :  { %v1147_v50 = vpop.f32.mrb[1].mxu0  ;;  %v1195_v51 = vpop.f32.mrb[1].mxu1 }
  0xf7   :  { %v1148_v52 = vadd.f32 %v1147_v50, %v1146_v48  ;;  %v1196_v53 = vadd.f32 %v1195_v51, %v1194_v49  ;;  %v1149_v54 = vpop.f32.mrb[2].mxu0  ;;  %v1197_v55 = vpop.f32.mrb[2].mxu1  ;;  %v715_v51 = vld [vmem:[%s1632_s2 + $0xa0] sm:$0xff] }
  0xf8   :  { %v1150_v56 = vpop.f32.mrb[3].mxu0  ;;  %v1198_v57 = vpop.f32.mrb[3].mxu1 }
  0xf9   :  { %v663_v58 = vmax.f32 %v1148_v52, 0.0  ;;  %v679_v60 = vmax.f32 %v1196_v53, 0.0  ;;  %v1151_v61 = vadd.f32 %v1150_v56, %v1149_v54  ;;  %v1199_v62 = vadd.f32 %v1198_v57, %v1197_v55  ;;  %v700_v52 = vld [vmem:[%s1632_s2 + $0x28] sm:$0xff] }
  0xfa   :  { %v716_v53 = vld [vmem:[%s1632_s2 + $0xa8] sm:$0xff] }
  0xfb   :  { %v664_v2 = vmax.f32 %v1151_v61, 0.0  ;;  %v680_v3 = vmax.f32 %v1199_v62, 0.0  ;;  %v727_v4 = vmul.f32 %v695_v59, %v663_v58  ;;  %v743_v5 = vmul.f32 %v711_v63, %v679_v60 }
  0xfd   :  { %v728_v6 = vmul.f32 %v696_v0, %v664_v2  ;;  %v744_v7 = vmul.f32 %v712_v1, %v680_v3  ;;  %v1152_v8 = vpop.f32.mrb[4].mxu0  ;;  %v1200_v9 = vpop.f32.mrb[4].mxu1 }
  0xfe   :  { %v1153_v10 = vpop.f32.mrb[5].mxu0  ;;  %v1201_v11 = vpop.f32.mrb[5].mxu1 }
  0xff   :  { %v1038_v12 = vpack.c.bf16 %v728_v6, %v727_v4  ;;  %v1078_v13 = vpack.c.bf16 %v744_v7, %v743_v5  ;;  %v1154_v14 = vadd.f32 %v1153_v10, %v1152_v8  ;;  %v1202_v15 = vadd.f32 %v1201_v11, %v1200_v9  ;;  %v1155_v16 = vpop.f32.mrb[6].mxu0  ;;  %v1203_v17 = vpop.f32.mrb[6].mxu1  ;;  %v701_v9 = vld [vmem:[%s1632_s2 + $0x30] sm:$0xff] }
 0x100   :  { %v1156_v18 = vpop.f32.mrb[7].mxu0  ;;  %v1204_v19 = vpop.f32.mrb[7].mxu1 }
 0x101   :  { %1039 = vst [vmem:[%s1633_s3] sm:$0xff] %v1038_v12   ;;  %1122 = vst [vmem:[%s1633_s3 + $0x40] sm:$0xff] %v1078_v13   ;;  %v665_v20 = vmax.f32 %v1154_v14, 0.0  ;;  %v681_v22 = vmax.f32 %v1202_v15, 0.0  ;;  %v1157_v23 = vadd.f32 %v1156_v18, %v1155_v16  ;;  %v1205_v24 = vadd.f32 %v1204_v19, %v1203_v17  ;;  %v717_v13 = vld [vmem:[%s1632_s2 + $0xb0] sm:$0xff]  ;;  %v702_v14 = vld [vmem:[%s1632_s2 + $0x38] sm:$0xff] }
 0x102   :  { %v718_v15 = vld [vmem:[%s1632_s2 + $0xb8] sm:$0xff] }
 0x103   :  { %v666_v28 = vmax.f32 %v1157_v23, 0.0  ;;  %v682_v29 = vmax.f32 %v1205_v24, 0.0  ;;  %v729_v30 = vmul.f32 %v697_v21, %v665_v20  ;;  %v745_v31 = vmul.f32 %v713_v25, %v681_v22 }
 0x105   :  { %v730_v32 = vmul.f32 %v698_v26, %v666_v28  ;;  %v746_v33 = vmul.f32 %v714_v27, %v682_v29  ;;  %v1158_v34 = vpop.f32.mrb[8].mxu0  ;;  %v1206_v35 = vpop.f32.mrb[8].mxu1 }
 0x106   :  { %v1159_v36 = vpop.f32.mrb[9].mxu0  ;;  %v1207_v37 = vpop.f32.mrb[9].mxu1 }
 0x107   :  { %v1043_v38 = vpack.c.bf16 %v730_v32, %v729_v30  ;;  %v1083_v39 = vpack.c.bf16 %v746_v33, %v745_v31  ;;  %v1160_v40 = vadd.f32 %v1159_v36, %v1158_v34  ;;  %v1208_v41 = vadd.f32 %v1207_v37, %v1206_v35  ;;  %v1161_v42 = vpop.f32.mrb[10].mxu0  ;;  %v1209_v43 = vpop.f32.mrb[10].mxu1  ;;  %v703_v35 = vld [vmem:[%s1632_s2 + $0x40] sm:$0xff] }
 0x108   :  { %v1162_v44 = vpop.f32.mrb[11].mxu0  ;;  %v1210_v45 = vpop.f32.mrb[11].mxu1 }
 0x109   :  { %1115 = vst [vmem:[%s1633_s3 + $0x8] sm:$0xff] %v1043_v38   ;;  %1123 = vst [vmem:[%s1633_s3 + $0x48] sm:$0xff] %v1083_v39   ;;  %v667_v46 = vmax.f32 %v1160_v40, 0.0  ;;  %v683_v48 = vmax.f32 %v1208_v41, 0.0  ;;  %v1163_v49 = vadd.f32 %v1162_v44, %v1161_v42  ;;  %v1211_v50 = vadd.f32 %v1210_v45, %v1209_v43  ;;  %v719_v39 = vld [vmem:[%s1632_s2 + $0xc0] sm:$0xff]  ;;  %v704_v40 = vld [vmem:[%s1632_s2 + $0x48] sm:$0xff] }
 0x10a   :  { %v720_v41 = vld [vmem:[%s1632_s2 + $0xc8] sm:$0xff] }
 0x10b   :  { %v668_v54 = vmax.f32 %v1163_v49, 0.0  ;;  %v684_v55 = vmax.f32 %v1211_v50, 0.0  ;;  %v731_v56 = vmul.f32 %v699_v47, %v667_v46  ;;  %v747_v57 = vmul.f32 %v715_v51, %v683_v48 }
 0x10d   :  { %v732_v58 = vmul.f32 %v700_v52, %v668_v54  ;;  %v748_v59 = vmul.f32 %v716_v53, %v684_v55  ;;  %v1164_v60 = vpop.f32.mrb[12].mxu0  ;;  %v1212_v61 = vpop.f32.mrb[12].mxu1 }
 0x10e   :  { %v1165_v62 = vpop.f32.mrb[13].mxu0  ;;  %v1213_v63 = vpop.f32.mrb[13].mxu1 }
 0x10f   :  { %v1048_v0 = vpack.c.bf16 %v732_v58, %v731_v56  ;;  %v1088_v1 = vpack.c.bf16 %v748_v59, %v747_v57  ;;  %v1166_v2 = vadd.f32 %v1165_v62, %v1164_v60  ;;  %v1214_v3 = vadd.f32 %v1213_v63, %v1212_v61  ;;  %v1167_v4 = vpop.f32.mrb[14].mxu0  ;;  %v1215_v5 = vpop.f32.mrb[14].mxu1  ;;  %v705_v61 = vld [vmem:[%s1632_s2 + $0x50] sm:$0xff] }
 0x110   :  { %v1168_v6 = vpop.f32.mrb[15].mxu0  ;;  %v1216_v7 = vpop.f32.mrb[15].mxu1 }
 0x111   :  { %1116 = vst [vmem:[%s1633_s3 + $0x10] sm:$0xff] %v1048_v0   ;;  %1124 = vst [vmem:[%s1633_s3 + $0x50] sm:$0xff] %v1088_v1   ;;  %v669_v8 = vmax.f32 %v1166_v2, 0.0  ;;  %v685_v10 = vmax.f32 %v1214_v3, 0.0  ;;  %v1169_v11 = vadd.f32 %v1168_v6, %v1167_v4  ;;  %v1217_v12 = vadd.f32 %v1216_v7, %v1215_v5  ;;  %v721_v1 = vld [vmem:[%s1632_s2 + $0xd0] sm:$0xff]  ;;  %v706_v2 = vld [vmem:[%s1632_s2 + $0x58] sm:$0xff] }
 0x112   :  { %v722_v3 = vld [vmem:[%s1632_s2 + $0xd8] sm:$0xff] }
 0x113   :  { %v670_v16 = vmax.f32 %v1169_v11, 0.0  ;;  %v686_v17 = vmax.f32 %v1217_v12, 0.0  ;;  %v733_v18 = vmul.f32 %v701_v9, %v669_v8  ;;  %v749_v19 = vmul.f32 %v717_v13, %v685_v10 }
 0x115   :  { %v734_v20 = vmul.f32 %v702_v14, %v670_v16  ;;  %v750_v21 = vmul.f32 %v718_v15, %v686_v17  ;;  %v1170_v22 = vpop.f32.mrb[16].mxu0  ;;  %v1218_v23 = vpop.f32.mrb[16].mxu1 }
 0x116   :  { %v1171_v24 = vpop.f32.mrb[17].mxu0  ;;  %v1219_v25 = vpop.f32.mrb[17].mxu1 }
 0x117   :  { %v1053_v26 = vpack.c.bf16 %v734_v20, %v733_v18  ;;  %v1093_v27 = vpack.c.bf16 %v750_v21, %v749_v19  ;;  %v1172_v28 = vadd.f32 %v1171_v24, %v1170_v22  ;;  %v1220_v29 = vadd.f32 %v1219_v25, %v1218_v23  ;;  %v1173_v30 = vpop.f32.mrb[18].mxu0  ;;  %v1221_v31 = vpop.f32.mrb[18].mxu1  ;;  %v707_v23 = vld [vmem:[%s1632_s2 + $0x60] sm:$0xff] }
 0x118   :  { %v1174_v32 = vpop.f32.mrb[19].mxu0  ;;  %v1222_v33 = vpop.f32.mrb[19].mxu1 }
 0x119   :  { %1117 = vst [vmem:[%s1633_s3 + $0x18] sm:$0xff] %v1053_v26   ;;  %1125 = vst [vmem:[%s1633_s3 + $0x58] sm:$0xff] %v1093_v27   ;;  %v671_v34 = vmax.f32 %v1172_v28, 0.0  ;;  %v687_v36 = vmax.f32 %v1220_v29, 0.0  ;;  %v1175_v37 = vadd.f32 %v1174_v32, %v1173_v30  ;;  %v1223_v38 = vadd.f32 %v1222_v33, %v1221_v31  ;;  %v723_v27 = vld [vmem:[%s1632_s2 + $0xe0] sm:$0xff]  ;;  %v708_v28 = vld [vmem:[%s1632_s2 + $0x68] sm:$0xff] }
 0x11a   :  { %v724_v29 = vld [vmem:[%s1632_s2 + $0xe8] sm:$0xff] }
 0x11b   :  { %v672_v42 = vmax.f32 %v1175_v37, 0.0  ;;  %v688_v43 = vmax.f32 %v1223_v38, 0.0  ;;  %v735_v44 = vmul.f32 %v703_v35, %v671_v34  ;;  %v751_v45 = vmul.f32 %v719_v39, %v687_v36 }
 0x11d   :  { %v736_v46 = vmul.f32 %v704_v40, %v672_v42  ;;  %v752_v47 = vmul.f32 %v720_v41, %v688_v43  ;;  %v1176_v48 = vpop.f32.mrb[20].mxu0  ;;  %v1224_v49 = vpop.f32.mrb[20].mxu1 }
 0x11e   :  { %v1177_v50 = vpop.f32.mrb[21].mxu0  ;;  %v1225_v51 = vpop.f32.mrb[21].mxu1 }
 0x11f   :  { %v1058_v52 = vpack.c.bf16 %v736_v46, %v735_v44  ;;  %v1098_v53 = vpack.c.bf16 %v752_v47, %v751_v45  ;;  %v1178_v54 = vadd.f32 %v1177_v50, %v1176_v48  ;;  %v1226_v55 = vadd.f32 %v1225_v51, %v1224_v49  ;;  %v1179_v56 = vpop.f32.mrb[22].mxu0  ;;  %v1227_v57 = vpop.f32.mrb[22].mxu1  ;;  %v709_v49 = vld [vmem:[%s1632_s2 + $0x70] sm:$0xff] }
 0x120   :  { %v1180_v58 = vpop.f32.mrb[23].mxu0  ;;  %v1228_v59 = vpop.f32.mrb[23].mxu1 }
 0x121   :  { %1118 = vst [vmem:[%s1633_s3 + $0x20] sm:$0xff] %v1058_v52   ;;  %1126 = vst [vmem:[%s1633_s3 + $0x60] sm:$0xff] %v1098_v53   ;;  %v673_v60 = vmax.f32 %v1178_v54, 0.0  ;;  %v689_v62 = vmax.f32 %v1226_v55, 0.0  ;;  %v1181_v63 = vadd.f32 %v1180_v58, %v1179_v56  ;;  %v1229_v0 = vadd.f32 %v1228_v59, %v1227_v57  ;;  %v725_v53 = vld [vmem:[%s1632_s2 + $0xf0] sm:$0xff]  ;;  %v710_v54 = vld [vmem:[%s1632_s2 + $0x78] sm:$0xff] }
 0x122   :  { %v726_v55 = vld [vmem:[%s1632_s2 + $0xf8] sm:$0xff] }
 0x123   :  { %v674_v4 = vmax.f32 %v1181_v63, 0.0  ;;  %v690_v5 = vmax.f32 %v1229_v0, 0.0  ;;  %v737_v6 = vmul.f32 %v705_v61, %v673_v60  ;;  %v753_v7 = vmul.f32 %v721_v1, %v689_v62 }
 0x125   :  { %v738_v8 = vmul.f32 %v706_v2, %v674_v4  ;;  %v754_v9 = vmul.f32 %v722_v3, %v690_v5  ;;  %v1182_v10 = vpop.f32.mrb[24].mxu0  ;;  %v1230_v11 = vpop.f32.mrb[24].mxu1 }
 0x126   :  { %v1183_v12 = vpop.f32.mrb[25].mxu0  ;;  %v1231_v13 = vpop.f32.mrb[25].mxu1 }
 0x127   :  { %v1063_v14 = vpack.c.bf16 %v738_v8, %v737_v6  ;;  %v1103_v15 = vpack.c.bf16 %v754_v9, %v753_v7  ;;  %v1184_v16 = vadd.f32 %v1183_v12, %v1182_v10  ;;  %v1232_v17 = vadd.f32 %v1231_v13, %v1230_v11  ;;  %v1185_v18 = vpop.f32.mrb[26].mxu0  ;;  %v1233_v19 = vpop.f32.mrb[26].mxu1 }
 0x128   :  { %v1186_v20 = vpop.f32.mrb[27].mxu0  ;;  %v1234_v21 = vpop.f32.mrb[27].mxu1 }
 0x129   :  { %1119 = vst [vmem:[%s1633_s3 + $0x28] sm:$0xff] %v1063_v14   ;;  %1127 = vst [vmem:[%s1633_s3 + $0x68] sm:$0xff] %v1103_v15   ;;  %v675_v22 = vmax.f32 %v1184_v16, 0.0  ;;  %v691_v24 = vmax.f32 %v1232_v17, 0.0  ;;  %v1187_v25 = vadd.f32 %v1186_v20, %v1185_v18  ;;  %v1235_v26 = vadd.f32 %v1234_v21, %v1233_v19 }
 0x12b   :  { %v676_v30 = vmax.f32 %v1187_v25, 0.0  ;;  %v692_v31 = vmax.f32 %v1235_v26, 0.0  ;;  %v739_v32 = vmul.f32 %v707_v23, %v675_v22  ;;  %v755_v33 = vmul.f32 %v723_v27, %v691_v24 }
 0x12d   :  { %v740_v34 = vmul.f32 %v708_v28, %v676_v30  ;;  %v756_v35 = vmul.f32 %v724_v29, %v692_v31  ;;  %v1188_v36 = vpop.f32.mrb[28].mxu0  ;;  %v1236_v37 = vpop.f32.mrb[28].mxu1 }
 0x12e   :  { %v1189_v38 = vpop.f32.mrb[29].mxu0  ;;  %v1237_v39 = vpop.f32.mrb[29].mxu1 }
 0x12f   :  { %v1068_v40 = vpack.c.bf16 %v740_v34, %v739_v32  ;;  %v1108_v41 = vpack.c.bf16 %v756_v35, %v755_v33  ;;  %v1190_v42 = vadd.f32 %v1189_v38, %v1188_v36  ;;  %v1238_v43 = vadd.f32 %v1237_v39, %v1236_v37  ;;  %v1191_v44 = vpop.f32.mrb[30].mxu0  ;;  %v1239_v45 = vpop.f32.mrb[30].mxu1 }
 0x130   :  { %v1192_v46 = vpop.f32.mrb[31].mxu0  ;;  %v1240_v47 = vpop.f32.mrb[31].mxu1 }
 0x131   :  { %1120 = vst [vmem:[%s1633_s3 + $0x30] sm:$0xff] %v1068_v40   ;;  %1128 = vst [vmem:[%s1633_s3 + $0x70] sm:$0xff] %v1108_v41   ;;  %v677_v48 = vmax.f32 %v1190_v42, 0.0  ;;  %v693_v50 = vmax.f32 %v1238_v43, 0.0  ;;  %v1193_v51 = vadd.f32 %v1192_v46, %v1191_v44  ;;  %v1241_v52 = vadd.f32 %v1240_v47, %v1239_v45 }
 0x133   :  { %v678_v56 = vmax.f32 %v1193_v51, 0.0  ;;  %v694_v57 = vmax.f32 %v1241_v52, 0.0  ;;  %v741_v58 = vmul.f32 %v709_v49, %v677_v48  ;;  %v757_v59 = vmul.f32 %v725_v53, %v693_v50 }
 0x135   :  { %v742_v60 = vmul.f32 %v710_v54, %v678_v56  ;;  %v758_v61 = vmul.f32 %v726_v55, %v694_v57 }
 0x137   :  { %v1073_v62 = vpack.c.bf16 %v742_v60, %v741_v58  ;;  %v1113_v63 = vpack.c.bf16 %v758_v61, %v757_v59 }
 0x139   :  { %1121 = vst [vmem:[%s1633_s3 + $0x38] sm:$0xff] %v1073_v62   ;;  %1129 = vst [vmem:[%s1633_s3 + $0x78] sm:$0xff] %v1113_v63  }

</bundles_post_ra>
